<compile_context>
chip_gen: v7x
topology: tpu7x:2x2x1
jax: 0.10.0
libtpu: 0.0.40
codegen_flags: <defaults>
</compile_context>

<pallas_src>
import functools

import jax
import jax.numpy as jnp
from jax.experimental import pallas as pl
from jax.experimental.pallas import tpu as pltpu

BN_EPS = 1e-5


def _round_up(v, m):
    return (v + m - 1) // m * m


# ----------------------------------------------------------------------------
# Fused encoder-stack kernel: one grid step == one EncoderLayer
# ----------------------------------------------------------------------------
def encoder_stack_kernel(
    x_ref,                                    # (BN, Ep)  f32, read at layer 0
    wqkv_ref,                                 # (Ep, 3Ep) bf16  [Q|K|V], Q pre-scaled
    wo_ref,                                   # (Ep, Ep)  bf16
    w1_ref, b1_ref, w2_ref,                   # FF weights / first bias
    g1_ref, be1_ref, g2_ref, be2_ref,         # BatchNorm1d affine params (zero-padded)
    o_ref,                                    # (BN, Ep)  f32, activation carrier
    attn_ref,                                 # (BN, Ep)  f32 scratch: per-head outputs
    *, n_heads, B, N, E, Ep,
):
    BN = B * N
    D = E // n_heads

    # o_ref doubles as the VMEM-resident activation carried across layers.
    @pl.when(pl.program_id(0) == 0)
    def _():
        o_ref[...] = x_ref[...]
        attn_ref[...] = jnp.zeros_like(attn_ref)   # keep padded lanes exactly 0

    xf = o_ref[...]                           # (BN, Ep) float32
    xb = xf.astype(jnp.bfloat16)

    # ---- fused QKV projection (1/sqrt(D) folded into the Q slice); one bf16
    # ---- cast of the whole result instead of per-head casts ----------------
    qkv = jnp.dot(xb, wqkv_ref[...],
                  preferred_element_type=jnp.float32).astype(jnp.bfloat16)   # (BN, 3Ep)

    # ---- multi-head attention; head outputs written to a scratch slab ------
    # TODO(synk): optional attention `mask` of the PyTorch forward is not
    # implemented (the reference call path uses mask=None).
    for h in range(n_heads):                  # small static unroll
        qh = qkv[:, h * D:(h + 1) * D].reshape(B, N, D)
        kh = qkv[:, Ep + h * D:Ep + (h + 1) * D].reshape(B, N, D)
        vh = qkv[:, 2 * Ep + h * D:2 * Ep + (h + 1) * D].reshape(B, N, D)

        s = jnp.einsum('bnd,bmd->bnm', qh, kh,
                       preferred_element_type=jnp.float32)       # (B, N, N)
        s = s - jnp.max(s, axis=-1, keepdims=True)
        p = jnp.exp(s)
        p = p * pl.reciprocal(jnp.sum(p, axis=-1, keepdims=True), approx=True)

        oh = jnp.einsum('bnm,bmd->bnd', p.astype(jnp.bfloat16), vh,
                        preferred_element_type=jnp.float32)      # (B, N, D)
        attn_ref[:, h * D:(h + 1) * D] = oh.reshape(BN, D)

    # single full-depth combine matmul (replaces H tiny K=D matmuls + adds);
    # padded rows of wo are zero, so padded scratch lanes contribute nothing.
    mha = jnp.dot(attn_ref[...].astype(jnp.bfloat16), wo_ref[...],
                  preferred_element_type=jnp.float32)            # (BN, Ep)

    # combine bias bo omitted: cancelled exactly by BN1's mean subtraction.
    h1 = xf + mha

    # ---- BatchNorm1d #1 (training mode, biased variance, single pass) ------
    mu1 = jnp.mean(h1, axis=0, keepdims=True)
    var1 = jnp.maximum(jnp.mean(h1 * h1, axis=0, keepdims=True) - mu1 * mu1, 0.0)
    h1n = (h1 - mu1) * jax.lax.rsqrt(var1 + BN_EPS) * g1_ref[...] + be1_ref[...]

    # ---- feed forward (Linear -> ReLU -> Linear) + residual -----------------
    ff = jnp.dot(h1n.astype(jnp.bfloat16), w1_ref[...],
                 preferred_element_type=jnp.float32) + b1_ref[...]
    ff = jnp.maximum(ff, 0.0)
    # second FF bias b2 omitted: cancelled exactly by BN2's mean subtraction.
    ff = jnp.dot(ff.astype(jnp.bfloat16), w2_ref[...],
                 preferred_element_type=jnp.float32)
    h2 = h1n + ff

    # ---- BatchNorm1d #2 ------------------------------------------------------
    mu2 = jnp.mean(h2, axis=0, keepdims=True)
    var2 = jnp.maximum(jnp.mean(h2 * h2, axis=0, keepdims=True) - mu2 * mu2, 0.0)
    o_ref[...] = (h2 - mu2) * jax.lax.rsqrt(var2 + BN_EPS) * g2_ref[...] + be2_ref[...]


# ----------------------------------------------------------------------------
# Wrapper: lane-dense padding + single fused pallas_call over all layers
# ----------------------------------------------------------------------------
def encoder_stack_forward(x, params, n_heads):
    B, N, E = x.shape
    assert E % n_heads == 0
    BN = B * N
    Ep = _round_up(E, 128)          # lane-dense embedding width
    Fp = _round_up(4 * E, 128)      # lane-dense FF hidden width
    L = params['wqkv'].shape[0]

    def pad2(w, r, c):              # zero-pad the trailing two dims of (L, ., .)
        return jnp.pad(w, ((0, 0), (0, r - w.shape[1]), (0, c - w.shape[2])))

    # Q/K/V blocks padded independently so slices sit at 0, Ep, 2Ep.
    wq = params['wqkv'][:, :, :E]
    wk = params['wqkv'][:, :, E:2 * E]
    wv = params['wqkv'][:, :, 2 * E:]
    wqkv_p = jnp.concatenate(
        [pad2(wq, Ep, Ep), pad2(wk, Ep, Ep), pad2(wv, Ep, Ep)], axis=-1)

    wo_p = pad2(params['wo'], Ep, Ep)
    w1_p = pad2(params['w1'], Ep, Fp)
    b1_p = pad2(params['b1'], 1, Fp)
    w2_p = pad2(params['w2'], Fp, Ep)
    g1_p = pad2(params['g1'], 1, Ep)          # gamma/beta padded with ZEROS so
    be1_p = pad2(params['be1'], 1, Ep)        # padded output columns stay 0
    g2_p = pad2(params['g2'], 1, Ep)
    be2_p = pad2(params['be2'], 1, Ep)

    x2d = jnp.pad(x.reshape(BN, E), ((0, 0), (0, Ep - E)))   # lane-dense f32

    kernel = functools.partial(encoder_stack_kernel,
                               n_heads=n_heads, B=B, N=N, E=E, Ep=Ep)

    def w_spec(shape):                        # per-layer weight: pick slice l
        nd = len(shape)
        return pl.BlockSpec((None,) + tuple(shape), lambda l, nd=nd: (l,) + (0,) * nd)

    in_specs = [
        pl.BlockSpec((BN, Ep), lambda l: (0, 0)),   # x (consumed at layer 0)
        w_spec((Ep, 3 * Ep)),                       # wqkv (bf16)
        w_spec((Ep, Ep)),                           # wo   (bf16)
        w_spec((Ep, Fp)),                           # w1   (bf16)
        w_spec((1, Fp)),                            # b1
        w_spec((Fp, Ep)),                           # w2   (bf16)
        w_spec((1, Ep)), w_spec((1, Ep)),           # g1, be1
        w_spec((1, Ep)), w_spec((1, Ep)),           # g2, be2
    ]

    out = pl.pallas_call(
        kernel,
        out_shape=jax.ShapeDtypeStruct((BN, Ep), jnp.float32),
        grid_spec=pltpu.PrefetchScalarGridSpec(
            num_scalar_prefetch=0,
            grid=(L,),
            in_specs=in_specs,
            out_specs=pl.BlockSpec((BN, Ep), lambda l: (0, 0)),
            scratch_shapes=[pltpu.VMEM((BN, Ep), jnp.float32)],   # head-output slab
        ),
        compiler_params=pltpu.CompilerParams(
            # layer axis carries the activation -> must stay sequential
            dimension_semantics=("arbitrary",),
            # 48 MiB: generous on v5e/v6e (128 MiB phys), safe on v7x (64 MiB).
            vmem_limit_bytes=48 * 1024 * 1024,
        ),
    )(x2d, wqkv_p, wo_p, w1_p, b1_p, w2_p, g1_p, be1_p, g2_p, be2_p)

    return out[:, :E].reshape(B, N, E)


# ----------------------------------------------------------------------------
# Deterministic parameter construction (weights stacked over layers, unpadded)
# ----------------------------------------------------------------------------
def make_params(key, n_layers, n_heads, E):
    D = E // n_heads
    q_scale = 1.0 / float(D) ** 0.5           # folded into Wq

    def lin(k, fi, fo, s=0.1):
        return jax.random.normal(k, (fi, fo), jnp.float32) * s

    cols = {k: [] for k in ('wqkv', 'wo', 'bo', 'w1', 'b1', 'w2', 'b2',
                            'g1', 'be1', 'g2', 'be2')}
    for lkey in jax.random.split(key, n_layers):
        lk = jax.random.split(lkey, 9)
        wq = lin(lk[0], E, E) * q_scale
        wk = lin(lk[1], E, E)
        wv = lin(lk[2], E, E)
        cols['wqkv'].append(jnp.concatenate([wq, wk, wv], axis=1).astype(jnp.bfloat16))
        cols['wo'].append(lin(lk[3], E, E).astype(jnp.bfloat16))
        cols['bo'].append(jax.random.normal(lk[4], (1, E), jnp.float32) * 0.01)
        cols['w1'].append(lin(lk[5], E, 4 * E).astype(jnp.bfloat16))
        cols['b1'].append(jax.random.normal(lk[6], (1, 4 * E), jnp.float32) * 0.01)
        cols['w2'].append(lin(lk[7], 4 * E, E).astype(jnp.bfloat16))
        cols['b2'].append(jax.random.normal(lk[8], (1, E), jnp.float32) * 0.01)
        cols['g1'].append(jnp.ones((1, E), jnp.float32))
        cols['be1'].append(jnp.zeros((1, E), jnp.float32))
        cols['g2'].append(jnp.ones((1, E), jnp.float32))
        cols['be2'].append(jnp.zeros((1, E), jnp.float32))
    return {k: jnp.stack(v, axis=0) for k, v in cols.items()}


# ----------------------------------------------------------------------------
# Pure-JAX reference (PyTorch semantics, biases included; exact softmax)
# ----------------------------------------------------------------------------
def encoder_stack_reference(x, params, n_heads):
    B, N, E = x.shape
    BN, D = B * N, E // n_heads
    h = x.reshape(BN, E).astype(jnp.float32)
    for l in range(params['wqkv'].shape[0]):
        xb = h.astype(jnp.bfloat16)
        qkv = jnp.dot(xb, params['wqkv'][l], preferred_element_type=jnp.float32)
        q, k, v = qkv[:, :E], qkv[:, E:2 * E], qkv[:, 2 * E:]
        mk = lambda t: t.reshape(B, N, n_heads, D).transpose(0, 2, 1, 3)
        q4, k4, v4 = mk(q), mk(k), mk(v)
        s = jnp.einsum('bhnd,bhmd->bhnm', q4.astype(jnp.bfloat16),
                       k4.astype(jnp.bfloat16), preferred_element_type=jnp.float32)
        p = jax.nn.softmax(s, axis=-1)
        o = jnp.einsum('bhnm,bhmd->bhnd', p.astype(jnp.bfloat16),
                       v4.astype(jnp.bfloat16), preferred_element_type=jnp.float32)
        attn = o.transpose(0, 2, 1, 3).reshape(BN, E)
        mha = jnp.dot(attn.astype(jnp.bfloat16), params['wo'][l],
                      preferred_element_type=jnp.float32) + params['bo'][l]
        h1 = h + mha
        mu1 = jnp.mean(h1, axis=0, keepdims=True)
        var1 = jnp.mean(h1 * h1, axis=0, keepdims=True) - mu1 * mu1
        h1n = (h1 - mu1) * jax.lax.rsqrt(var1 + BN_EPS) * params['g1'][l] + params['be1'][l]
        ff = jnp.dot(h1n.astype(jnp.bfloat16), params['w1'][l],
                     preferred_element_type=jnp.float32) + params['b1'][l]
        ff = jnp.maximum(ff, 0.0)
        ff = jnp.dot(ff.astype(jnp.bfloat16), params['w2'][l],
                     preferred_element_type=jnp.float32) + params['b2'][l]
        h2 = h1n + ff
        mu2 = jnp.mean(h2, axis=0, keepdims=True)
        var2 = jnp.mean(h2 * h2, axis=0, keepdims=True) - mu2 * mu2
        h = (h2 - mu2) * jax.lax.rsqrt(var2 + BN_EPS) * params['g2'][l] + params['be2'][l]
    return h.reshape(B, N, E)


# ----------------------------------------------------------------------------
if __name__ == "__main__":
    B, N = 2, 8                 # batch, sequence length
    EMBED_DIM = 32
    N_HEADS = 4
    N_LAYERS = 2

    key = jax.random.PRNGKey(0)
    kx, kp = jax.random.split(key)
    x = jax.random.normal(kx, (B, N, EMBED_DIM), jnp.float32)
    params = make_params(kp, N_LAYERS, N_HEADS, EMBED_DIM)

    out = encoder_stack_forward(x, params, N_HEADS)
    out = jax.block_until_ready(out)

    assert out.shape == (B, N, EMBED_DIM)
    assert bool(jnp.all(jnp.isfinite(out)))

    ref = encoder_stack_reference(x, params, N_HEADS)
    max_diff = float(jnp.max(jnp.abs(out - ref)))
    assert max_diff < 0.1, f"kernel/reference mismatch: max|diff|={max_diff}"

    print("KERNEL_OK")
</pallas_src>

<mosaic_0001>
module attributes {stable_mosaic.version = 11 : i64} {
  func.func @encoder_stack_kernel(%arg0: i32, %arg1: memref<16x128xf32, #tpu.memory_space<vmem>>, %arg2: memref<1x128x384xbf16, #tpu.memory_space<vmem>>, %arg3: memref<1x128x128xbf16, #tpu.memory_space<vmem>>, %arg4: memref<1x128x128xbf16, #tpu.memory_space<vmem>>, %arg5: memref<1x1x128xf32, #tpu.memory_space<vmem>>, %arg6: memref<1x128x128xbf16, #tpu.memory_space<vmem>>, %arg7: memref<1x1x128xf32, #tpu.memory_space<vmem>>, %arg8: memref<1x1x128xf32, #tpu.memory_space<vmem>>, %arg9: memref<1x1x128xf32, #tpu.memory_space<vmem>>, %arg10: memref<1x1x128xf32, #tpu.memory_space<vmem>>, %arg11: memref<16x128xf32, #tpu.memory_space<vmem>>, %arg12: memref<16x128xf32, #tpu.memory_space<vmem>>) attributes {dimension_semantics = [#tpu.dimension_semantics<arbitrary>], iteration_bounds = array<i64: 2>, scalar_prefetch = 0 : i64, scratch_operands = 1 : i64, tpu.core_type = #tpu.core_type<tc>, window_params = [{pipeline_mode = #tpu.pipeline_mode<synchronous>, transform_indices = @transform_0, window_bounds = array<i64: 16, 128>}, {transform_indices = @transform_1, window_bounds = array<i64: 1, 128, 384>}, {transform_indices = @transform_2, window_bounds = array<i64: 1, 128, 128>}, {transform_indices = @transform_3, window_bounds = array<i64: 1, 128, 128>}, {transform_indices = @transform_4, window_bounds = array<i64: 1, 1, 128>}, {transform_indices = @transform_5, window_bounds = array<i64: 1, 128, 128>}, {transform_indices = @transform_6, window_bounds = array<i64: 1, 1, 128>}, {transform_indices = @transform_7, window_bounds = array<i64: 1, 1, 128>}, {transform_indices = @transform_8, window_bounds = array<i64: 1, 1, 128>}, {transform_indices = @transform_9, window_bounds = array<i64: 1, 1, 128>}, {pipeline_mode = #tpu.pipeline_mode<synchronous>, transform_indices = @transform_10, window_bounds = array<i64: 16, 128>}]} {
    %c0_i32 = arith.constant 0 : i32
    %0 = arith.cmpi eq, %arg0, %c0_i32 : i32
    %1 = arith.extui %0 : i1 to i32
    %c0_i32_0 = arith.constant 0 : i32
    %2 = arith.cmpi ne, %1, %c0_i32_0 : i32
    scf.if %2 {
      %c0_70 = arith.constant 0 : index
      %c0_71 = arith.constant 0 : index
      %171 = vector.load %arg1[%c0_70, %c0_71] : memref<16x128xf32, #tpu.memory_space<vmem>>, vector<16x128xf32>
      %c0_72 = arith.constant 0 : index
      %c0_73 = arith.constant 0 : index
      %172 = vector.load %arg11[%c0_72, %c0_73] : memref<16x128xf32, #tpu.memory_space<vmem>>, vector<16x128xf32>
      tpu.vector_store %arg11[%c0_72, %c0_73], %171 {strides = array<i32>} : memref<16x128xf32, #tpu.memory_space<vmem>>, vector<16x128xf32>,
      %cst_74 = arith.constant 0.000000e+00 : f32
      %173 = vector.broadcast %cst_74 : f32 to vector<16x128xf32>
      %c0_75 = arith.constant 0 : index
      %c0_76 = arith.constant 0 : index
      %174 = vector.load %arg12[%c0_75, %c0_76] : memref<16x128xf32, #tpu.memory_space<vmem>>, vector<16x128xf32>
      tpu.vector_store %arg12[%c0_75, %c0_76], %173 {strides = array<i32>} : memref<16x128xf32, #tpu.memory_space<vmem>>, vector<16x128xf32>,
    } else {
    }
    %c0 = arith.constant 0 : index
    %c0_1 = arith.constant 0 : index
    %3 = vector.load %arg11[%c0, %c0_1] : memref<16x128xf32, #tpu.memory_space<vmem>>, vector<16x128xf32>
    %4 = arith.truncf %3 : vector<16x128xf32> to vector<16x128xbf16>
    %c0_2 = arith.constant 0 : index
    %c0_3 = arith.constant 0 : index
    %c0_4 = arith.constant 0 : index
    %5 = vector.load %arg2[%c0_2, %c0_3, %c0_4] : memref<1x128x384xbf16, #tpu.memory_space<vmem>>, vector<1x128x384xbf16>
    %6 = vector.shape_cast %5 : vector<1x128x384xbf16> to vector<128x384xbf16>
    %cst = arith.constant dense<0.000000e+00> : vector<16x384xf32>
    %7 = tpu.matmul %4, %6, %cst {dimension_numbers = #tpu.dot_dimension_numbers<[1], [0], [0], [1], [0, 0, 1, 1], [], []>} : vector<16x128xbf16>, vector<128x384xbf16>, vector<16x384xf32> -> vector<16x384xf32>
    %8 = arith.truncf %7 : vector<16x384xf32> to vector<16x384xbf16>
    %9 = vector.extract_strided_slice %8 {offsets = [0, 0], sizes = [16, 8], strides = [1, 1]} : vector<16x384xbf16> to vector<16x8xbf16>
    %10 = vector.shape_cast %9 : vector<16x8xbf16> to vector<2x8x8xbf16>
    %11 = vector.extract_strided_slice %8 {offsets = [0, 128], sizes = [16, 8], strides = [1, 1]} : vector<16x384xbf16> to vector<16x8xbf16>
    %12 = vector.shape_cast %11 : vector<16x8xbf16> to vector<2x8x8xbf16>
    %13 = vector.extract_strided_slice %8 {offsets = [0, 256], sizes = [16, 8], strides = [1, 1]} : vector<16x384xbf16> to vector<16x8xbf16>
    %14 = vector.shape_cast %13 : vector<16x8xbf16> to vector<2x8x8xbf16>
    "tpu.trace_start"() <{level = 10 : i32, message = "bnd,bmd->bnm"}> : () -> ()
    %cst_5 = arith.constant dense<0.000000e+00> : vector<2x8x8xf32>
    %15 = tpu.matmul %10, %12, %cst_5 {dimension_numbers = #tpu.dot_dimension_numbers<[2], [2], [1], [1], [0, 0, 0, 1, 1, 1], [0], [0]>} : vector<2x8x8xbf16>, vector<2x8x8xbf16>, vector<2x8x8xf32> -> vector<2x8x8xf32>
    "tpu.trace_stop"() : () -> ()
    %cst_6 = arith.constant dense<0xFF800000> : vector<2x8xf32>
    %16 = vector.multi_reduction <maximumf>, %15, %cst_6 [2] : vector<2x8x8xf32> to vector<2x8xf32>
    %17 = vector.shape_cast %16 : vector<2x8xf32> to vector<2x8x1xf32>
    %18 = vector.broadcast %17 : vector<2x8x1xf32> to vector<2x8x8xf32>
    %19 = arith.subf %15, %18 : vector<2x8x8xf32>
    %20 = math.exp %19 : vector<2x8x8xf32>
    %cst_7 = arith.constant dense<0.000000e+00> : vector<2x8xf32>
    %21 = vector.multi_reduction <add>, %20, %cst_7 [2] : vector<2x8x8xf32> to vector<2x8xf32>
    %22 = vector.shape_cast %21 : vector<2x8xf32> to vector<2x8x1xf32>
    %23 = tpu.reciprocal %22 {approx = true} : vector<2x8x1xf32> -> vector<2x8x1xf32>
    %24 = vector.broadcast %23 : vector<2x8x1xf32> to vector<2x8x8xf32>
    %25 = arith.mulf %20, %24 : vector<2x8x8xf32>
    %26 = arith.truncf %25 : vector<2x8x8xf32> to vector<2x8x8xbf16>
    "tpu.trace_start"() <{level = 10 : i32, message = "bnm,bmd->bnd"}> : () -> ()
    %cst_8 = arith.constant dense<0.000000e+00> : vector<2x8x8xf32>
    %27 = tpu.matmul %26, %14, %cst_8 {dimension_numbers = #tpu.dot_dimension_numbers<[2], [1], [1], [2], [0, 0, 0, 1, 1, 2], [0], [0]>} : vector<2x8x8xbf16>, vector<2x8x8xbf16>, vector<2x8x8xf32> -> vector<2x8x8xf32>
    "tpu.trace_stop"() : () -> ()
    %28 = vector.shape_cast %27 : vector<2x8x8xf32> to vector<16x8xf32>
    %c0_9 = arith.constant 0 : index
    %c0_10 = arith.constant 0 : index
    %29 = vector.load %arg12[%c0_9, %c0_10] : memref<16x128xf32, #tpu.memory_space<vmem>>, vector<16x8xf32>
    tpu.vector_store %arg12[%c0_9, %c0_10], %28 {strides = array<i32>} : memref<16x128xf32, #tpu.memory_space<vmem>>, vector<16x8xf32>,
    %30 = vector.extract_strided_slice %8 {offsets = [0, 8], sizes = [16, 8], strides = [1, 1]} : vector<16x384xbf16> to vector<16x8xbf16>
    %31 = vector.shape_cast %30 : vector<16x8xbf16> to vector<2x8x8xbf16>
    %32 = vector.extract_strided_slice %8 {offsets = [0, 136], sizes = [16, 8], strides = [1, 1]} : vector<16x384xbf16> to vector<16x8xbf16>
    %33 = vector.shape_cast %32 : vector<16x8xbf16> to vector<2x8x8xbf16>
    %34 = vector.extract_strided_slice %8 {offsets = [0, 264], sizes = [16, 8], strides = [1, 1]} : vector<16x384xbf16> to vector<16x8xbf16>
    %35 = vector.shape_cast %34 : vector<16x8xbf16> to vector<2x8x8xbf16>
    "tpu.trace_start"() <{level = 10 : i32, message = "bnd,bmd->bnm"}> : () -> ()
    %cst_11 = arith.constant dense<0.000000e+00> : vector<2x8x8xf32>
    %36 = tpu.matmul %31, %33, %cst_11 {dimension_numbers = #tpu.dot_dimension_numbers<[2], [2], [1], [1], [0, 0, 0, 1, 1, 1], [0], [0]>} : vector<2x8x8xbf16>, vector<2x8x8xbf16>, vector<2x8x8xf32> -> vector<2x8x8xf32>
    "tpu.trace_stop"() : () -> ()
    %cst_12 = arith.constant dense<0xFF800000> : vector<2x8xf32>
    %37 = vector.multi_reduction <maximumf>, %36, %cst_12 [2] : vector<2x8x8xf32> to vector<2x8xf32>
    %38 = vector.shape_cast %37 : vector<2x8xf32> to vector<2x8x1xf32>
    %39 = vector.broadcast %38 : vector<2x8x1xf32> to vector<2x8x8xf32>
    %40 = arith.subf %36, %39 : vector<2x8x8xf32>
    %41 = math.exp %40 : vector<2x8x8xf32>
    %cst_13 = arith.constant dense<0.000000e+00> : vector<2x8xf32>
    %42 = vector.multi_reduction <add>, %41, %cst_13 [2] : vector<2x8x8xf32> to vector<2x8xf32>
    %43 = vector.shape_cast %42 : vector<2x8xf32> to vector<2x8x1xf32>
    %44 = tpu.reciprocal %43 {approx = true} : vector<2x8x1xf32> -> vector<2x8x1xf32>
    %45 = vector.broadcast %44 : vector<2x8x1xf32> to vector<2x8x8xf32>
    %46 = arith.mulf %41, %45 : vector<2x8x8xf32>
    %47 = arith.truncf %46 : vector<2x8x8xf32> to vector<2x8x8xbf16>
    "tpu.trace_start"() <{level = 10 : i32, message = "bnm,bmd->bnd"}> : () -> ()
    %cst_14 = arith.constant dense<0.000000e+00> : vector<2x8x8xf32>
    %48 = tpu.matmul %47, %35, %cst_14 {dimension_numbers = #tpu.dot_dimension_numbers<[2], [1], [1], [2], [0, 0, 0, 1, 1, 2], [0], [0]>} : vector<2x8x8xbf16>, vector<2x8x8xbf16>, vector<2x8x8xf32> -> vector<2x8x8xf32>
    "tpu.trace_stop"() : () -> ()
    %49 = vector.shape_cast %48 : vector<2x8x8xf32> to vector<16x8xf32>
    %c0_15 = arith.constant 0 : index
    %c8 = arith.constant 8 : index
    %50 = vector.load %arg12[%c0_15, %c8] : memref<16x128xf32, #tpu.memory_space<vmem>>, vector<16x8xf32>
    tpu.vector_store %arg12[%c0_15, %c8], %49 {strides = array<i32>} : memref<16x128xf32, #tpu.memory_space<vmem>>, vector<16x8xf32>,
    %51 = vector.extract_strided_slice %8 {offsets = [0, 16], sizes = [16, 8], strides = [1, 1]} : vector<16x384xbf16> to vector<16x8xbf16>
    %52 = vector.shape_cast %51 : vector<16x8xbf16> to vector<2x8x8xbf16>
    %53 = vector.extract_strided_slice %8 {offsets = [0, 144], sizes = [16, 8], strides = [1, 1]} : vector<16x384xbf16> to vector<16x8xbf16>
    %54 = vector.shape_cast %53 : vector<16x8xbf16> to vector<2x8x8xbf16>
    %55 = vector.extract_strided_slice %8 {offsets = [0, 272], sizes = [16, 8], strides = [1, 1]} : vector<16x384xbf16> to vector<16x8xbf16>
    %56 = vector.shape_cast %55 : vector<16x8xbf16> to vector<2x8x8xbf16>
    "tpu.trace_start"() <{level = 10 : i32, message = "bnd,bmd->bnm"}> : () -> ()
    %cst_16 = arith.constant dense<0.000000e+00> : vector<2x8x8xf32>
    %57 = tpu.matmul %52, %54, %cst_16 {dimension_numbers = #tpu.dot_dimension_numbers<[2], [2], [1], [1], [0, 0, 0, 1, 1, 1], [0], [0]>} : vector<2x8x8xbf16>, vector<2x8x8xbf16>, vector<2x8x8xf32> -> vector<2x8x8xf32>
    "tpu.trace_stop"() : () -> ()
    %cst_17 = arith.constant dense<0xFF800000> : vector<2x8xf32>
    %58 = vector.multi_reduction <maximumf>, %57, %cst_17 [2] : vector<2x8x8xf32> to vector<2x8xf32>
    %59 = vector.shape_cast %58 : vector<2x8xf32> to vector<2x8x1xf32>
    %60 = vector.broadcast %59 : vector<2x8x1xf32> to vector<2x8x8xf32>
    %61 = arith.subf %57, %60 : vector<2x8x8xf32>
    %62 = math.exp %61 : vector<2x8x8xf32>
    %cst_18 = arith.constant dense<0.000000e+00> : vector<2x8xf32>
    %63 = vector.multi_reduction <add>, %62, %cst_18 [2] : vector<2x8x8xf32> to vector<2x8xf32>
    %64 = vector.shape_cast %63 : vector<2x8xf32> to vector<2x8x1xf32>
    %65 = tpu.reciprocal %64 {approx = true} : vector<2x8x1xf32> -> vector<2x8x1xf32>
    %66 = vector.broadcast %65 : vector<2x8x1xf32> to vector<2x8x8xf32>
    %67 = arith.mulf %62, %66 : vector<2x8x8xf32>
    %68 = arith.truncf %67 : vector<2x8x8xf32> to vector<2x8x8xbf16>
    "tpu.trace_start"() <{level = 10 : i32, message = "bnm,bmd->bnd"}> : () -> ()
    %cst_19 = arith.constant dense<0.000000e+00> : vector<2x8x8xf32>
    %69 = tpu.matmul %68, %56, %cst_19 {dimension_numbers = #tpu.dot_dimension_numbers<[2], [1], [1], [2], [0, 0, 0, 1, 1, 2], [0], [0]>} : vector<2x8x8xbf16>, vector<2x8x8xbf16>, vector<2x8x8xf32> -> vector<2x8x8xf32>
    "tpu.trace_stop"() : () -> ()
    %70 = vector.shape_cast %69 : vector<2x8x8xf32> to vector<16x8xf32>
    %c0_20 = arith.constant 0 : index
    %c16 = arith.constant 16 : index
    %71 = vector.load %arg12[%c0_20, %c16] : memref<16x128xf32, #tpu.memory_space<vmem>>, vector<16x8xf32>
    tpu.vector_store %arg12[%c0_20, %c16], %70 {strides = array<i32>} : memref<16x128xf32, #tpu.memory_space<vmem>>, vector<16x8xf32>,
    %72 = vector.extract_strided_slice %8 {offsets = [0, 24], sizes = [16, 8], strides = [1, 1]} : vector<16x384xbf16> to vector<16x8xbf16>
    %73 = vector.shape_cast %72 : vector<16x8xbf16> to vector<2x8x8xbf16>
    %74 = vector.extract_strided_slice %8 {offsets = [0, 152], sizes = [16, 8], strides = [1, 1]} : vector<16x384xbf16> to vector<16x8xbf16>
    %75 = vector.shape_cast %74 : vector<16x8xbf16> to vector<2x8x8xbf16>
    %76 = vector.extract_strided_slice %8 {offsets = [0, 280], sizes = [16, 8], strides = [1, 1]} : vector<16x384xbf16> to vector<16x8xbf16>
    %77 = vector.shape_cast %76 : vector<16x8xbf16> to vector<2x8x8xbf16>
    "tpu.trace_start"() <{level = 10 : i32, message = "bnd,bmd->bnm"}> : () -> ()
    %cst_21 = arith.constant dense<0.000000e+00> : vector<2x8x8xf32>
    %78 = tpu.matmul %73, %75, %cst_21 {dimension_numbers = #tpu.dot_dimension_numbers<[2], [2], [1], [1], [0, 0, 0, 1, 1, 1], [0], [0]>} : vector<2x8x8xbf16>, vector<2x8x8xbf16>, vector<2x8x8xf32> -> vector<2x8x8xf32>
    "tpu.trace_stop"() : () -> ()
    %cst_22 = arith.constant dense<0xFF800000> : vector<2x8xf32>
    %79 = vector.multi_reduction <maximumf>, %78, %cst_22 [2] : vector<2x8x8xf32> to vector<2x8xf32>
    %80 = vector.shape_cast %79 : vector<2x8xf32> to vector<2x8x1xf32>
    %81 = vector.broadcast %80 : vector<2x8x1xf32> to vector<2x8x8xf32>
    %82 = arith.subf %78, %81 : vector<2x8x8xf32>
    %83 = math.exp %82 : vector<2x8x8xf32>
    %cst_23 = arith.constant dense<0.000000e+00> : vector<2x8xf32>
    %84 = vector.multi_reduction <add>, %83, %cst_23 [2] : vector<2x8x8xf32> to vector<2x8xf32>
    %85 = vector.shape_cast %84 : vector<2x8xf32> to vector<2x8x1xf32>
    %86 = tpu.reciprocal %85 {approx = true} : vector<2x8x1xf32> -> vector<2x8x1xf32>
    %87 = vector.broadcast %86 : vector<2x8x1xf32> to vector<2x8x8xf32>
    %88 = arith.mulf %83, %87 : vector<2x8x8xf32>
    %89 = arith.truncf %88 : vector<2x8x8xf32> to vector<2x8x8xbf16>
    "tpu.trace_start"() <{level = 10 : i32, message = "bnm,bmd->bnd"}> : () -> ()
    %cst_24 = arith.constant dense<0.000000e+00> : vector<2x8x8xf32>
    %90 = tpu.matmul %89, %77, %cst_24 {dimension_numbers = #tpu.dot_dimension_numbers<[2], [1], [1], [2], [0, 0, 0, 1, 1, 2], [0], [0]>} : vector<2x8x8xbf16>, vector<2x8x8xbf16>, vector<2x8x8xf32> -> vector<2x8x8xf32>
    "tpu.trace_stop"() : () -> ()
    %91 = vector.shape_cast %90 : vector<2x8x8xf32> to vector<16x8xf32>
    %c0_25 = arith.constant 0 : index
    %c24 = arith.constant 24 : index
    %92 = vector.load %arg12[%c0_25, %c24] : memref<16x128xf32, #tpu.memory_space<vmem>>, vector<16x8xf32>
    tpu.vector_store %arg12[%c0_25, %c24], %91 {strides = array<i32>} : memref<16x128xf32, #tpu.memory_space<vmem>>, vector<16x8xf32>,
    %c0_26 = arith.constant 0 : index
    %c0_27 = arith.constant 0 : index
    %93 = vector.load %arg12[%c0_26, %c0_27] : memref<16x128xf32, #tpu.memory_space<vmem>>, vector<16x128xf32>
    %94 = arith.truncf %93 : vector<16x128xf32> to vector<16x128xbf16>
    %c0_28 = arith.constant 0 : index
    %c0_29 = arith.constant 0 : index
    %c0_30 = arith.constant 0 : index
    %95 = vector.load %arg3[%c0_28, %c0_29, %c0_30] : memref<1x128x128xbf16, #tpu.memory_space<vmem>>, vector<1x128x128xbf16>
    %96 = vector.shape_cast %95 : vector<1x128x128xbf16> to vector<128x128xbf16>
    %cst_31 = arith.constant dense<0.000000e+00> : vector<16x128xf32>
    %97 = tpu.matmul %94, %96, %cst_31 {dimension_numbers = #tpu.dot_dimension_numbers<[1], [0], [0], [1], [0, 0, 1, 1], [], []>} : vector<16x128xbf16>, vector<128x128xbf16>, vector<16x128xf32> -> vector<16x128xf32>
    %98 = arith.addf %3, %97 : vector<16x128xf32>
    %cst_32 = arith.constant dense<0.000000e+00> : vector<128xf32>
    %99 = vector.multi_reduction <add>, %98, %cst_32 [0] : vector<16x128xf32> to vector<128xf32>
    %100 = vector.shape_cast %99 : vector<128xf32> to vector<1x128xf32>
    %cst_33 = arith.constant 1.600000e+01 : f32
    %101 = vector.broadcast %cst_33 : f32 to vector<1x128xf32>
    %102 = arith.divf %100, %101 : vector<1x128xf32>
    %103 = arith.mulf %98, %98 : vector<16x128xf32>
    %cst_34 = arith.constant dense<0.000000e+00> : vector<128xf32>
    %104 = vector.multi_reduction <add>, %103, %cst_34 [0] : vector<16x128xf32> to vector<128xf32>
    %105 = vector.shape_cast %104 : vector<128xf32> to vector<1x128xf32>
    %cst_35 = arith.constant 1.600000e+01 : f32
    %106 = vector.broadcast %cst_35 : f32 to vector<1x128xf32>
    %107 = arith.divf %105, %106 : vector<1x128xf32>
    %108 = arith.mulf %102, %102 : vector<1x128xf32>
    %109 = arith.subf %107, %108 : vector<1x128xf32>
    %cst_36 = arith.constant 0.000000e+00 : f32
    %110 = vector.broadcast %cst_36 : f32 to vector<1x128xf32>
    %111 = arith.maximumf %109, %110 : vector<1x128xf32>
    %112 = vector.broadcast %102 : vector<1x128xf32> to vector<16x128xf32>
    %113 = arith.subf %98, %112 : vector<16x128xf32>
    %cst_37 = arith.constant 9.99999974E-6 : f32
    %114 = vector.broadcast %cst_37 : f32 to vector<1x128xf32>
    %115 = arith.addf %111, %114 : vector<1x128xf32>
    %116 = math.rsqrt %115 : vector<1x128xf32>
    %117 = vector.broadcast %116 : vector<1x128xf32> to vector<16x128xf32>
    %118 = arith.mulf %113, %117 : vector<16x128xf32>
    %c0_38 = arith.constant 0 : index
    %c0_39 = arith.constant 0 : index
    %c0_40 = arith.constant 0 : index
    %119 = vector.load %arg7[%c0_38, %c0_39, %c0_40] : memref<1x1x128xf32, #tpu.memory_space<vmem>>, vector<1x1x128xf32>
    %120 = vector.shape_cast %119 : vector<1x1x128xf32> to vector<1x128xf32>
    %121 = vector.broadcast %120 : vector<1x128xf32> to vector<16x128xf32>
    %122 = arith.mulf %118, %121 : vector<16x128xf32>
    %c0_41 = arith.constant 0 : index
    %c0_42 = arith.constant 0 : index
    %c0_43 = arith.constant 0 : index
    %123 = vector.load %arg8[%c0_41, %c0_42, %c0_43] : memref<1x1x128xf32, #tpu.memory_space<vmem>>, vector<1x1x128xf32>
    %124 = vector.shape_cast %123 : vector<1x1x128xf32> to vector<1x128xf32>
    %125 = vector.broadcast %124 : vector<1x128xf32> to vector<16x128xf32>
    %126 = arith.addf %122, %125 : vector<16x128xf32>
    %127 = arith.truncf %126 : vector<16x128xf32> to vector<16x128xbf16>
    %c0_44 = arith.constant 0 : index
    %c0_45 = arith.constant 0 : index
    %c0_46 = arith.constant 0 : index
    %128 = vector.load %arg4[%c0_44, %c0_45, %c0_46] : memref<1x128x128xbf16, #tpu.memory_space<vmem>>, vector<1x128x128xbf16>
    %129 = vector.shape_cast %128 : vector<1x128x128xbf16> to vector<128x128xbf16>
    %cst_47 = arith.constant dense<0.000000e+00> : vector<16x128xf32>
    %130 = tpu.matmul %127, %129, %cst_47 {dimension_numbers = #tpu.dot_dimension_numbers<[1], [0], [0], [1], [0, 0, 1, 1], [], []>} : vector<16x128xbf16>, vector<128x128xbf16>, vector<16x128xf32> -> vector<16x128xf32>
    %c0_48 = arith.constant 0 : index
    %c0_49 = arith.constant 0 : index
    %c0_50 = arith.constant 0 : index
    %131 = vector.load %arg5[%c0_48, %c0_49, %c0_50] : memref<1x1x128xf32, #tpu.memory_space<vmem>>, vector<1x1x128xf32>
    %132 = vector.shape_cast %131 : vector<1x1x128xf32> to vector<1x128xf32>
    %133 = vector.broadcast %132 : vector<1x128xf32> to vector<16x128xf32>
    %134 = arith.addf %130, %133 : vector<16x128xf32>
    %cst_51 = arith.constant 0.000000e+00 : f32
    %135 = vector.broadcast %cst_51 : f32 to vector<16x128xf32>
    %136 = arith.maximumf %134, %135 : vector<16x128xf32>
    %137 = arith.truncf %136 : vector<16x128xf32> to vector<16x128xbf16>
    %c0_52 = arith.constant 0 : index
    %c0_53 = arith.constant 0 : index
    %c0_54 = arith.constant 0 : index
    %138 = vector.load %arg6[%c0_52, %c0_53, %c0_54] : memref<1x128x128xbf16, #tpu.memory_space<vmem>>, vector<1x128x128xbf16>
    %139 = vector.shape_cast %138 : vector<1x128x128xbf16> to vector<128x128xbf16>
    %cst_55 = arith.constant dense<0.000000e+00> : vector<16x128xf32>
    %140 = tpu.matmul %137, %139, %cst_55 {dimension_numbers = #tpu.dot_dimension_numbers<[1], [0], [0], [1], [0, 0, 1, 1], [], []>} : vector<16x128xbf16>, vector<128x128xbf16>, vector<16x128xf32> -> vector<16x128xf32>
    %141 = arith.addf %126, %140 : vector<16x128xf32>
    %cst_56 = arith.constant dense<0.000000e+00> : vector<128xf32>
    %142 = vector.multi_reduction <add>, %141, %cst_56 [0] : vector<16x128xf32> to vector<128xf32>
    %143 = vector.shape_cast %142 : vector<128xf32> to vector<1x128xf32>
    %cst_57 = arith.constant 1.600000e+01 : f32
    %144 = vector.broadcast %cst_57 : f32 to vector<1x128xf32>
    %145 = arith.divf %143, %144 : vector<1x128xf32>
    %146 = arith.mulf %141, %141 : vector<16x128xf32>
    %cst_58 = arith.constant dense<0.000000e+00> : vector<128xf32>
    %147 = vector.multi_reduction <add>, %146, %cst_58 [0] : vector<16x128xf32> to vector<128xf32>
    %148 = vector.shape_cast %147 : vector<128xf32> to vector<1x128xf32>
    %cst_59 = arith.constant 1.600000e+01 : f32
    %149 = vector.broadcast %cst_59 : f32 to vector<1x128xf32>
    %150 = arith.divf %148, %149 : vector<1x128xf32>
    %151 = arith.mulf %145, %145 : vector<1x128xf32>
    %152 = arith.subf %150, %151 : vector<1x128xf32>
    %cst_60 = arith.constant 0.000000e+00 : f32
    %153 = vector.broadcast %cst_60 : f32 to vector<1x128xf32>
    %154 = arith.maximumf %152, %153 : vector<1x128xf32>
    %155 = vector.broadcast %145 : vector<1x128xf32> to vector<16x128xf32>
    %156 = arith.subf %141, %155 : vector<16x128xf32>
    %cst_61 = arith.constant 9.99999974E-6 : f32
    %157 = vector.broadcast %cst_61 : f32 to vector<1x128xf32>
    %158 = arith.addf %154, %157 : vector<1x128xf32>
    %159 = math.rsqrt %158 : vector<1x128xf32>
    %160 = vector.broadcast %159 : vector<1x128xf32> to vector<16x128xf32>
    %161 = arith.mulf %156, %160 : vector<16x128xf32>
    %c0_62 = arith.constant 0 : index
    %c0_63 = arith.constant 0 : index
    %c0_64 = arith.constant 0 : index
    %162 = vector.load %arg9[%c0_62, %c0_63, %c0_64] : memref<1x1x128xf32, #tpu.memory_space<vmem>>, vector<1x1x128xf32>
    %163 = vector.shape_cast %162 : vector<1x1x128xf32> to vector<1x128xf32>
    %164 = vector.broadcast %163 : vector<1x128xf32> to vector<16x128xf32>
    %165 = arith.mulf %161, %164 : vector<16x128xf32>
    %c0_65 = arith.constant 0 : index
    %c0_66 = arith.constant 0 : index
    %c0_67 = arith.constant 0 : index
    %166 = vector.load %arg10[%c0_65, %c0_66, %c0_67] : memref<1x1x128xf32, #tpu.memory_space<vmem>>, vector<1x1x128xf32>
    %167 = vector.shape_cast %166 : vector<1x1x128xf32> to vector<1x128xf32>
    %168 = vector.broadcast %167 : vector<1x128xf32> to vector<16x128xf32>
    %169 = arith.addf %165, %168 : vector<16x128xf32>
    %c0_68 = arith.constant 0 : index
    %c0_69 = arith.constant 0 : index
    %170 = vector.load %arg11[%c0_68, %c0_69] : memref<16x128xf32, #tpu.memory_space<vmem>>, vector<16x128xf32>
    tpu.vector_store %arg11[%c0_68, %c0_69], %169 {strides = array<i32>} : memref<16x128xf32, #tpu.memory_space<vmem>>, vector<16x128xf32>,
    return
  }
  func.func @transform_0(%arg0: i32) -> (i32, i32) {
    %c0_i32 = arith.constant 0 : i32
    %c0_i32_0 = arith.constant 0 : i32
    %c0_i32_1 = arith.constant 0 : i32
    return %c0_i32, %c0_i32_0 : i32, i32
  }
  func.func @transform_1(%arg0: i32) -> (i32, i32, i32) {
    %c0_i32 = arith.constant 0 : i32
    %c0_i32_0 = arith.constant 0 : i32
    %c0_i32_1 = arith.constant 0 : i32
    return %arg0, %c0_i32, %c0_i32_0 : i32, i32, i32
  }
  func.func @transform_2(%arg0: i32) -> (i32, i32, i32) {
    %c0_i32 = arith.constant 0 : i32
    %c0_i32_0 = arith.constant 0 : i32
    %c0_i32_1 = arith.constant 0 : i32
    return %arg0, %c0_i32, %c0_i32_0 : i32, i32, i32
  }
  func.func @transform_3(%arg0: i32) -> (i32, i32, i32) {
    %c0_i32 = arith.constant 0 : i32
    %c0_i32_0 = arith.constant 0 : i32
    %c0_i32_1 = arith.constant 0 : i32
    return %arg0, %c0_i32, %c0_i32_0 : i32, i32, i32
  }
  func.func @transform_4(%arg0: i32) -> (i32, i32, i32) {
    %c0_i32 = arith.constant 0 : i32
    %c0_i32_0 = arith.constant 0 : i32
    %c0_i32_1 = arith.constant 0 : i32
    return %arg0, %c0_i32, %c0_i32_0 : i32, i32, i32
  }
  func.func @transform_5(%arg0: i32) -> (i32, i32, i32) {
    %c0_i32 = arith.constant 0 : i32
    %c0_i32_0 = arith.constant 0 : i32
    %c0_i32_1 = arith.constant 0 : i32
    return %arg0, %c0_i32, %c0_i32_0 : i32, i32, i32
  }
  func.func @transform_6(%arg0: i32) -> (i32, i32, i32) {
    %c0_i32 = arith.constant 0 : i32
    %c0_i32_0 = arith.constant 0 : i32
    %c0_i32_1 = arith.constant 0 : i32
    return %arg0, %c0_i32, %c0_i32_0 : i32, i32, i32
  }
  func.func @transform_7(%arg0: i32) -> (i32, i32, i32) {
    %c0_i32 = arith.constant 0 : i32
    %c0_i32_0 = arith.constant 0 : i32
    %c0_i32_1 = arith.constant 0 : i32
    return %arg0, %c0_i32, %c0_i32_0 : i32, i32, i32
  }
  func.func @transform_8(%arg0: i32) -> (i32, i32, i32) {
    %c0_i32 = arith.constant 0 : i32
    %c0_i32_0 = arith.constant 0 : i32
    %c0_i32_1 = arith.constant 0 : i32
    return %arg0, %c0_i32, %c0_i32_0 : i32, i32, i32
  }
  func.func @transform_9(%arg0: i32) -> (i32, i32, i32) {
    %c0_i32 = arith.constant 0 : i32
    %c0_i32_0 = arith.constant 0 : i32
    %c0_i32_1 = arith.constant 0 : i32
    return %arg0, %c0_i32, %c0_i32_0 : i32, i32, i32
  }
  func.func @transform_10(%arg0: i32) -> (i32, i32) {
    %c0_i32 = arith.constant 0 : i32
    %c0_i32_0 = arith.constant 0 : i32
    %c0_i32_1 = arith.constant 0 : i32
    return %c0_i32, %c0_i32_0 : i32, i32
  }
}

</mosaic_0001>

<bundles_post_ra>
// kernel: tpu_custom_call.1
= control target key start
LH: loop header
LB: loop body
LE: loop exit
PB: predicated region body
PF: predicated region fallthrough
CT: control target
= control target key end

     0   :  { %s3794_s0 = inlined_call_operand.hbm [shape: f32[16,128], index: 0, kind: input, shape index: {}]   ;;  %s3795_s1 = inlined_call_operand.hbm [shape: bf16[2,128,384], index: 1, kind: input, shape index: {}]   ;;  %s3796_s2 = inlined_call_operand.hbm [shape: bf16[2,128,128], index: 2, kind: input, shape index: {}]   ;;  %s3797_s3 = inlined_call_operand.hbm [shape: bf16[2,128,128], index: 3, kind: input, shape index: {}]   ;;  %s3798_s4 = inlined_call_operand.vmem [shape: f32[2,1,128], index: 4, kind: input, shape index: {}]   ;;  %s3799_s5 = inlined_call_operand.hbm [shape: bf16[2,128,128], index: 5, kind: input, shape index: {}]   ;;  %s3800_s6 = inlined_call_operand.vmem [shape: f32[2,1,128], index: 6, kind: input, shape index: {}]   ;;  %s3801_s7 = inlined_call_operand.vmem [shape: f32[2,1,128], index: 7, kind: input, shape index: {}]   ;;  %s3802_s8 = inlined_call_operand.vmem [shape: f32[2,1,128], index: 8, kind: input, shape index: {}]   ;;  %s3803_s9 = inlined_call_operand.vmem [shape: f32[2,1,128], index: 9, kind: input, shape index: {}]   ;;  %s3804_s10 = inlined_call_operand.hbm [shape: f32[16,128], index: 10, kind: output, shape index: {}]  }
   0x1   :  { %3821 = sst [smem:[#allocation20_spill]] %s3795_s1 }
   0x2   :  { %3822 = sst [smem:[#allocation21_spill]] %s3797_s3 }
   0x3   :  { %3823 = sst [smem:[#allocation22_spill]] %s3803_s9 }
   0x4   :  { %3824 = sst [smem:[#allocation23_spill]] %s3804_s10 }
   0x5   :  { %15 = vsyncpa [#allocation4], 0 }
   0x6   :  { %16 = vsyncpa [#allocation7], 0 }
   0x7   :  { %18 = vsyncpa [#allocation7 + $0x1], 0 }
   0x8   :  { %19 = vsyncpa [#allocation10], 0 }
   0x9   :  { %21 = vsyncpa [#allocation10 + $0x1], 0 }
   0xa   :  { %22 = vsyncpa [#allocation5], 0  ;;  %s3187_s13 = smov 0   ;;  %s3189_s14 = smov 0  }
   0xb   :  { %s3191_s15 = smov 0   ;;  %s3193_s16 = smov 0  }
   0xc LB: > { %3825 = sst [smem:[#allocation17_spill]] %s3103_s15  ;;  %s3208_s17 = sadd.s32 1, %s3107_s16   ;;  %s3107_s16 = sphi %s3193_s16, %s3848_s16   ;;  %s3103_s15 = sphi %s3191_s15, %s3850_s15   ;;  %s3099_s14 = sphi %s3189_s14, %s3852_s14   ;;  %s3095_s13 = sphi %s3187_s13, %s3851_s13  }
   0xd   : > { %3826 = sst [smem:[#allocation18_spill]] %s3208_s17  ;;  %s56_s18 = sadd.s32 1, %s3103_s15 }
   0xe   : > { %s53_s19 = ssub.s32 %s3107_s16, %s3208_s17  ;;  %p63_p0 = scmp.ne.s32.totalorder %s3103_s15, %s3099_s14 }
   0xf   : > { %p54_p1 = scmp.eq.s32.totalorder %s53_s19, 0  ;;  %p64_p2 = scmp.eq.s32.totalorder %s3107_s16, 0 }
  0x10   : > { %p2740_p3 = scmp.lt.s32.totalorder %s3107_s16, 2  ;;  %s3805_s21 = sand.u32 1, %s3107_s16  }
  0x11   : > { %s3218_s20 = scalar_select %p54_p1, %s3103_s15, %s56_s18  }
  0x12   : > { %p65_p4 = por %p64_p2, %p63_p0  ;;  %s337_s22 = sand.u32 1, %s3103_s15  }
  0x13   : > { %3827 = sst [smem:[#allocation19_spill]] %s3218_s20  ;;  %s2703_s23 = smul.u32 192, %s337_s22 }
  0x14   : > { %p3224_p5 = pnand %p2740_p3, %p65_p4  ;;  %s2704_s25 = smul.u32 3072, %s3107_s16 }
  0x15   : > { %s3829_s1 = sld [smem:[#allocation20_spill]]  ;;  %s339_s29 = scalar_lea.vmem [#allocation6], %s2703_s23 }
  0x16   : > { %s3828_s24 = scalar_select %p3224_p5, 1, 0 }
  0x17   : > { %s346_s30 = sshll.u32 %s339_s29, 4  ;;  %s3238_s11 = scalar_lea.sflag [#allocation7], %s3805_s21  ;;  %s3234_s30 = int_to_ptr.vmem [resolvable:$true] %s346_s30 }
  0x18   : > { %p3244_p7 = pneg %p3224_p5 }
  0x1a   : > { %s3830_s18 = scalar_select %p3244_p7, 1, 0 }
  0x1b   : > { %s3232_s28 = scalar_lea.hbm %s3829_s1, %s2704_s25  ;;  %s2892_s23 = scalar_lea.hbm %s3829_s1, 6144 }
  0x1c   : > { %s2887_s12 = scalar_lea.hbm %s3232_s28, 3072  ;;  %p2893_p10 = scmp.lt.u32.totalorder %s3232_s28, %s3829_s1 }
  0x1d   : > { %p2888_p6 = scmp.ne.s32.totalorder %s3232_s28, %s2887_s12  ;;  %p2894_p11 = scmp.lt.u32.totalorder %s2892_s23, %s2887_s12 }
  0x1e   : > { %p2896_p13 = scmp.lt.u32.totalorder %s2887_s12, %s3232_s28 }
  0x1f   : > { %p2890_p8 = pnand %p3244_p7, %p2888_p6  ;;  %p2895_p12 = por %p2894_p11, %p2893_p10 }
  0x21   : > { %p2891_p9 = pneg %p2890_p8  ;;  %p2897_p0 = por %p2896_p13, %p2895_p12 }
  0x23   : > { %p2898_p1 = pnand %p2897_p0, %p2891_p9 }
  0x25   : > { %2901 = shalt.err (!%p2898_p1)
}
  0x26   : > { %s2902_s29 = scalar_lea.vmem %s3234_s30, 3072  ;;  %s3109_s19 = smov [#allocation6]  }
  0x27   : > { %p2903_p2 = scmp.ne.s32.totalorder %s3234_s30, %s2902_s29  ;;  %s2907_s25 = sshll.u32 %s3109_s19, 4  ;;  %s2908_s25 = int_to_ptr.vmem [resolvable:$false] %s2907_s25 }
  0x28   : > { %s2909_s26 = scalar_lea.vmem %s2908_s25, 6144  ;;  %p2910_p6 = scmp.lt.s32.totalorder %s3234_s30, %s2908_s25 }
  0x29   : > { %p2905_p3 = pnand %p2903_p2, %p3244_p7  ;;  %p2911_p8 = scmp.lt.s32.totalorder %s2909_s26, %s2902_s29 }
  0x2b   : > { %p2906_p4 = pneg %p2905_p3  ;;  %p2912_p10 = por %p2911_p8, %p2910_p6 }
  0x2d   : > { %p2913_p11 = pnand %p2912_p10, %p2906_p4 }
  0x2f   : > { %2916 = shalt.err (!%p2913_p11)
}
  0x30   : > { %s3110_s12 = smov 192   ;;  %s3111_s23 = smov 12  }
  0x31   : > { %2729 = dma.hbm_to_vmem [thread:$0]  (!%p3224_p5), %s3232_s28, 3072, %s3234_s30, %s3238_s11, %s3110_s12, %s3110_s12, %s3111_s23  }
  0x32   : > { %s3270_s27 = sshll.u32 %s337_s22, 6  ;;  %s3273_s29 = sshll.u32 %s3107_s16, 10 }
  0x33   : > { %s3831_s3 = sld [smem:[#allocation21_spill]]  ;;  %s381_s21 = scalar_lea.vmem [#allocation9], %s3270_s27 }
  0x34   : > { %s388_s1 = sshll.u32 %s381_s21, 4  ;;  %s3832_s28 = sand.u32 1, %s3107_s16   ;;  %s3282_s1 = int_to_ptr.vmem [resolvable:$true] %s388_s1 }
  0x35   : > { %s3286_s22 = scalar_lea.sflag [#allocation10], %s3832_s28 }
  0x39   : > { %s3279_s26 = scalar_lea.hbm %s3831_s3, %s3273_s29  ;;  %s2922_s19 = scalar_lea.hbm %s3831_s3, 2048 }
  0x3a   : > { %s2917_s30 = scalar_lea.hbm %s3279_s26, 1024  ;;  %p2923_p0 = scmp.lt.u32.totalorder %s3279_s26, %s3831_s3 }
  0x3b   : > { %p2918_p9 = scmp.ne.s32.totalorder %s3279_s26, %s2917_s30  ;;  %p2924_p1 = scmp.lt.u32.totalorder %s2922_s19, %s2917_s30 }
  0x3c   : > { %p2926_p3 = scmp.lt.u32.totalorder %s2917_s30, %s3279_s26 }
  0x3d   : > { %p2920_p12 = pnand %p2918_p9, %p3244_p7  ;;  %p2925_p2 = por %p2924_p1, %p2923_p0 }
  0x3f   : > { %p2921_p13 = pneg %p2920_p12  ;;  %p2927_p4 = por %p2926_p3, %p2925_p2 }
  0x41   : > { %p2928_p6 = pnand %p2927_p4, %p2921_p13 }
  0x43   : > { %2931 = shalt.err (!%p2928_p6)
}
  0x44   : > { %s2932_s21 = scalar_lea.vmem %s3282_s1, 1024  ;;  %s3112_s28 = smov [#allocation9]  }
  0x45   : > { %p2933_p8 = scmp.ne.s32.totalorder %s3282_s1, %s2932_s21  ;;  %s2937_s12 = sshll.u32 %s3112_s28, 4  ;;  %s2938_s12 = int_to_ptr.vmem [resolvable:$false] %s2937_s12 }
  0x46   : > { %s2939_s20 = scalar_lea.vmem %s2938_s12, 2048  ;;  %p2940_p9 = scmp.lt.s32.totalorder %s3282_s1, %s2938_s12 }
  0x47   : > { %p2935_p10 = pnand %p2933_p8, %p3244_p7  ;;  %p2941_p12 = scmp.lt.s32.totalorder %s2939_s20, %s2932_s21 }
  0x49   : > { %p2936_p11 = pneg %p2935_p10  ;;  %p2942_p0 = por %p2941_p12, %p2940_p9 }
  0x4b   : > { %p2943_p1 = pnand %p2942_p0, %p2936_p11 }
  0x4d   : > { %2946 = shalt.err (!%p2943_p1)
}
  0x4e   : > { %s3806_s30 = smov 64   ;;  %s3808_s23 = smov 4  }
  0x4f   : > { %2735 = dma.hbm_to_vmem [thread:$0]  (!%p3224_p5), %s3279_s26, 1024, %s3282_s1, %s3286_s22, %s3806_s30, %s3806_s30, %s3808_s23  }
  0x50   : > { %s3314_s19 = sadd.s32 4294967295, %s3107_s16   ;;  %p69_p13 = scmp.ne.s32.totalorder %s3099_s14, %s3095_s13 }
  0x51   : > { %p3813_p2 = scmp.eq.s32.totalorder %s3314_s19, 0  ;;  %p2352_p3 = scmp.ge.s32.totalorder %s3107_s16, 1 }
  0x52   : > { %p309_p4 = scmp.lt.s32.totalorder %s3107_s16, 3  ;;  %s3115_s1 = smov [#allocation3]  }
  0x53   : > { %p3323_p6 = por %p3813_p2, %p69_p13  ;;  %s321_s26 = sshll.u32 %s3115_s1, 4  ;;  %s322_s26 = int_to_ptr.vmem [resolvable:$true] %s321_s26 }
  0x54   : > { %p3328_p10 = pnand %p2352_p3, %p309_p4  ;;  %s3344_s12 = scalar_lea.hbm %s3796_s2, %s3273_s29 }
  0x55   : > { %s3833_s25 = scalar_select %p3323_p6, 1, 0 }
  0x56   : > { %s3834_s21 = scalar_select %p3328_p10, 1, 0 }
  0x57   : > { %p2722_p11 = pneg %p3328_p10  ;;  %s360_s20 = scalar_lea.vmem [#allocation8], %s3270_s27 }
  0x58   : > { %s367_s30 = sshll.u32 %s360_s20, 4  ;;  %s2947_s3 = scalar_lea.hbm %s3794_s0, 256  ;;  %s3347_s30 = int_to_ptr.vmem [resolvable:$true] %s367_s30 }
  0x59   : > { %p3336_p9 = pnand %p2722_p11, %p3813_p2  ;;  %p2948_p12 = scmp.ne.s32.totalorder %s3794_s0, %s2947_s3 }
  0x5a   : > { %p2954_p3 = scmp.lt.u32.totalorder %s2947_s3, %s3794_s0 }
  0x5b   : > { %p2949_p0 = pneg %p3336_p9 }
  0x5d   : > { %p2950_p1 = pnand %p2949_p0, %p2948_p12 }
  0x5f   : > { %p2951_p13 = pneg %p2950_p1 }
  0x61   : > { %p2956_p4 = pnand %p2954_p3, %p2951_p13 }
  0x63   : > { %2959 = shalt.err (!%p2956_p4)
}
  0x64   : > { %s2960_s20 = scalar_lea.vmem %s322_s26, 256  ;;  %p2968_p6 = scmp.lt.s32.totalorder %s322_s26, %s322_s26 }
  0x65   : > { %p2961_p11 = scmp.ne.s32.totalorder %s322_s26, %s2960_s20  ;;  %p2969_p10 = scmp.lt.s32.totalorder %s2960_s20, %s2960_s20 }
  0x67   : > { %p2963_p8 = pnand %p2961_p11, %p2949_p0  ;;  %p2970_p5 = por %p2969_p10, %p2968_p6 }
  0x69   : > { %p2964_p2 = pneg %p2963_p8 }
  0x6b   : > { %p2971_p7 = pnand %p2970_p5, %p2964_p2 }
  0x6d   : > { %2974 = shalt.err (!%p2971_p7)
}
  0x6e   : > { %s3116_s15 = smov 128   ;;  %s3117_s17 = smov 8  }
  0x6f   : > { %2725 = dma.hbm_to_vmem [thread:$0]  (!%p3336_p9), %s3794_s0, 256, %s322_s26, [#allocation4], %s3116_s15, %s3116_s15, %s3117_s17  }
  0x70   : > { %s2975_s1 = scalar_lea.hbm %s3344_s12, 1024  ;;  %p3836_p12 = scmp.ne.s32.totalorder %s3830_s18, 0 }
  0x71   : > { %p2976_p8 = scmp.ne.s32.totalorder %s3344_s12, %s2975_s1  ;;  %s2980_s20 = scalar_lea.hbm %s3796_s2, 2048 }
  0x72   : > { %p2981_p5 = scmp.lt.u32.totalorder %s3344_s12, %s3796_s2  ;;  %p2982_p7 = scmp.lt.u32.totalorder %s2980_s20, %s2975_s1 }
  0x73   : > { %p2978_p0 = pnand %p2976_p8, %p3836_p12  ;;  %p2984_p10 = scmp.lt.u32.totalorder %s2975_s1, %s3344_s12 }
  0x74   : > { %p2983_p2 = por %p2982_p7, %p2981_p5 }
  0x75   : > { %p2979_p6 = pneg %p2978_p0 }
  0x76   : > { %p2985_p1 = por %p2984_p10, %p2983_p2 }
  0x78   : > { %p2986_p13 = pnand %p2985_p1, %p2979_p6 }
  0x7a   : > { %2989 = shalt.err (!%p2986_p13)
}
  0x7b   : > { %s2990_s26 = scalar_lea.vmem %s3347_s30, 1024  ;;  %s3118_s13 = smov [#allocation8]  }
  0x7c   : > { %p2991_p9 = scmp.ne.s32.totalorder %s3347_s30, %s2990_s26  ;;  %s2995_s15 = sshll.u32 %s3118_s13, 4  ;;  %s2996_s15 = int_to_ptr.vmem [resolvable:$false] %s2995_s15 }
  0x7d   : > { %s2997_s9 = scalar_lea.vmem %s2996_s15, 2048  ;;  %p2998_p11 = scmp.lt.s32.totalorder %s3347_s30, %s2996_s15 }
  0x7e   : > { %p2993_p3 = pnand %p2991_p9, %p3836_p12  ;;  %p2999_p8 = scmp.lt.s32.totalorder %s2997_s9, %s2990_s26 }
  0x80   : > { %p2994_p4 = pneg %p2993_p3  ;;  %p3000_p0 = por %p2999_p8, %p2998_p11 }
  0x82   : > { %p3001_p5 = pnand %p3000_p0, %p2994_p4 }
  0x84   : > { %3004 = shalt.err (!%p3001_p5)
}
  0x85   : > { %p3837_p6 = scmp.ne.s32.totalorder %s3828_s24, 0  ;;  %s3838_s10 = smov 4  }
  0x86   : > { %s3839_s17 = smov 64   ;;  %s3394_s1 = scalar_lea.hbm %s3799_s5, %s3273_s29 }
  0x87   : > { %2732 = dma.hbm_to_vmem [thread:$0]  (!%p3837_p6), %s3344_s12, 1024, %s3347_s30, %s3238_s11, %s3839_s17, %s3839_s17, %s3838_s10  }
  0x88   : > { %s408_s16 = scalar_lea.vmem [#allocation11], %s3270_s27  ;;  %s3005_s20 = scalar_lea.hbm %s3394_s1, 1024 }
  0x89   : > { %s415_s28 = sshll.u32 %s408_s16, 4  ;;  %p3006_p7 = scmp.ne.s32.totalorder %s3394_s1, %s3005_s20  ;;  %s3397_s28 = int_to_ptr.vmem [resolvable:$true] %s415_s28 }
  0x8a   : > { %s3010_s30 = scalar_lea.hbm %s3799_s5, 2048  ;;  %p3011_p1 = scmp.lt.u32.totalorder %s3394_s1, %s3799_s5 }
  0x8b   : > { %p3008_p2 = pnand %p3006_p7, %p3836_p12  ;;  %p3012_p13 = scmp.lt.u32.totalorder %s3010_s30, %s3005_s20 }
  0x8c   : > { %p3014_p3 = scmp.lt.u32.totalorder %s3005_s20, %s3394_s1 }
  0x8d   : > { %p3009_p10 = pneg %p3008_p2  ;;  %p3013_p9 = por %p3012_p13, %p3011_p1 }
  0x8f   : > { %p3015_p4 = por %p3014_p3, %p3013_p9 }
  0x91   : > { %p3016_p11 = pnand %p3015_p4, %p3009_p10 }
  0x93   : > { %3019 = shalt.err (!%p3016_p11)
}
  0x94   : > { %s3020_s27 = scalar_lea.vmem %s3397_s28, 1024  ;;  %s3119_s13 = smov [#allocation11]  }
  0x95   : > { %p3021_p8 = scmp.ne.s32.totalorder %s3397_s28, %s3020_s27  ;;  %s3025_s15 = sshll.u32 %s3119_s13, 4  ;;  %s3026_s15 = int_to_ptr.vmem [resolvable:$false] %s3025_s15 }
  0x96   : > { %s3027_s9 = scalar_lea.vmem %s3026_s15, 2048  ;;  %p3028_p7 = scmp.lt.s32.totalorder %s3397_s28, %s3026_s15 }
  0x97   : > { %p3023_p0 = pnand %p3021_p8, %p3836_p12  ;;  %p3029_p2 = scmp.lt.s32.totalorder %s3027_s9, %s3020_s27 }
  0x99   : > { %p3024_p5 = pneg %p3023_p0  ;;  %p3030_p1 = por %p3029_p2, %p3028_p7 }
  0x9b   : > { %p3031_p13 = pnand %p3030_p1, %p3024_p5 }
  0x9d   : > { %3034 = shalt.err (!%p3031_p13)
}
  0x9e   : > { %2738 = dma.hbm_to_vmem [thread:$0]  (!%p3837_p6), %s3394_s1, 1024, %s3397_s28, %s3286_s22, %s3839_s17, %s3839_s17, %s3838_s10  }
  0x9f   : > { %p3840_p12 = scmp.ne.s32.totalorder %s3834_s21, 0 }
  0xa0   : > { %p3841_p10 = scmp.eq.s32.totalorder (!%p3840_p12), %s3314_s19, 0 }
  0xa1   : > { %451 = sbr.rel (%p3840_p12) target bundleno = 3732 (0xe94), region = 60 }
  0xa8   : > { %3078 = dma.done.wait (%p3841_p10), [#allocation4], 256   ;;  %p3842_p9 = pmov %p3841_p10 }
  0xa9   : > { %s457_s24 = sand.u32 1, %s3314_s19   ;;  %s459_s18 = sand.u32 1, %s3099_s14  }
  0xaa   : > { %3080 = vsyncadd (%p3842_p9), [#allocation4], 4294967040  ;;  %s2705_s3 = smul.u32 192, %s459_s18  ;;  %s458_s23 = scalar_lea.sflag [#allocation7], %s457_s24 }
  0xab   : > { %p3843_p3 = scmp.ne.s32.totalorder %s3833_s25, 0 }
  0xac   : > { %s3432_s16 = scalar_lea.vmem [#allocation6], %s2705_s3 }
  0xad   : > { %3082 = dma.done.wait (%p3843_p3), %s458_s23, 4096  }
  0xae   : > { %3084 = vsyncadd (%p3843_p3), %s458_s23, 4294963200  ;;  %s2367_s22 = sshll.u32 %s459_s18, 6  ;;  %s476_s10 = scalar_lea.sflag [#allocation10], %s457_s24 }
  0xaf   : > { %s3438_s21 = scalar_lea.vmem [#allocation8], %s2367_s22  ;;  %s3440_s17 = scalar_lea.vmem [#allocation9], %s2367_s22 }
  0xb0   : > { %3086 = dma.done.wait (%p3843_p3), %s476_s10, 2048  }
  0xb1   : > { %3088 = vsyncadd (%p3843_p3), %s476_s10, 4294965248  ;;  %p550_p6 = scmp.lt.s32.totalorder %s3314_s19, 1  ;;  %s3844_s3 = sld [smem:[#allocation22_spill]] }
  0xb2   : > { %s3470_s10 = scalar_lea.vmem [#allocation11], %s2367_s22  ;;  %p3845_p4 = scmp.ne.s32.totalorder %s3314_s19, 0 }
  0xb3   : > { %s3448_s1 = scalar_select %p550_p6, %s3314_s19, 1 }
  0xb4   : > { %569 = sbr.rel (%p3845_p4) target bundleno = 187 (0xbb), region = 84  ;;  %v570_v0 = vld [vmem:[#allocation3] sm:$0xff] (!%p3845_p4)  ;;  %v571_v1 = vld [vmem:[#allocation3 + $0x8] sm:$0xff] (!%p3845_p4)  ;;  %v3120_v2 = vmov (!%p3845_p4), 0.0  }
  0xb5   : > { %s552_s26 = scalar_lea.vmem %s3798_s4, %s3448_s1  ;;  %s555_s12 = scalar_lea.vmem %s3800_s6, %s3448_s1  ;;  %572 = vst [vmem:[#allocation12] sm:$0xff] (!%p3845_p4), %v570_v0  ;;  %573 = vst [vmem:[#allocation12 + $0x8] sm:$0xff] (!%p3845_p4), %v571_v1 }
  0xb6   : > { %s558_s27 = scalar_lea.vmem %s3801_s7, %s3448_s1  ;;  %s561_s9 = scalar_lea.vmem %s3802_s8, %s3448_s1  ;;  %574 = vst [vmem:[#allocation2] sm:$0xff] (!%p3845_p4), %v3120_v2  ;;  %575 = vst [vmem:[#allocation2 + $0x8] sm:$0xff] (!%p3845_p4), %v3120_v2 }
  0xb7   : > { %s564_s23 = scalar_lea.vmem %s3844_s3, %s3448_s1 }
  0xbb PF: > { %v2795_v3 = vld [vmem:[%s3432_s16 + $0x4] ss:$12 sps:$4 sm:$0xff]   ;;  %v2797_v4 = vld [vmem:[%s3432_s16] ss:$12 sps:$4 sm:$0xff]   ;;  %v3121_v5 = vmov 0   ;;  %v3122_v6 = vmov 0.0  }
  0xbc   : > { %771 = vmatprep.mubr.bf16.mxu0 %v3121_v5  ;;  %2527 = vmatprep.subr.bf16.mxu1 %v3122_v6  ;;  %v2798_v7 = vld [vmem:[%s3432_s16 + $0x1c] ss:$12 sps:$4 sm:$0xff]   ;;  %v2800_v8 = vld [vmem:[%s3432_s16 + $0x18] ss:$12 sps:$4 sm:$0xff]   ;;  %v2801_v9 = vld [vmem:[%s3432_s16 + $0x34] ss:$12 sps:$4 sm:$0xff]  }
  0xbd   : > { %739 = vmatprep.subr.bf16.mxu0 %v2795_v3  ;;  %v2803_v10 = vld [vmem:[%s3432_s16 + $0x30] ss:$12 sps:$4 sm:$0xff]   ;;  %v2804_v11 = vld [vmem:[%s3432_s16 + $0x4c] ss:$12 sps:$4 sm:$0xff]   ;;  %v2806_v12 = vld [vmem:[%s3432_s16 + $0x48] ss:$12 sps:$4 sm:$0xff]  }
  0xbe   : > { %740 = vmatpush1.bf16.msra.mxu0 %v2797_v4  ;;  %v2807_v13 = vld [vmem:[%s3432_s16 + $0x64] ss:$12 sps:$4 sm:$0xff]   ;;  %v2819_v14 = vld [vmem:[%s3432_s16 + $0x8] ss:$12 sps:$4 sm:$0xff]   ;;  %v2820_v15 = vld [vmem:[%s3432_s16 + $0x20] ss:$12 sps:$4 sm:$0xff]  }
  0xbf   : > { %741 = vmatprep.subr.bf16.mxu0 %v2798_v7  ;;  %2528 = vmatpush3.bf16.msra.mxu1 %v2819_v14  ;;  %v2809_v16 = vld [vmem:[%s3432_s16 + $0x60] ss:$12 sps:$4 sm:$0xff]   ;;  %v2810_v17 = vld [vmem:[%s3432_s16 + $0x7c] ss:$12 sps:$4 sm:$0xff]   ;;  %v2812_v18 = vld [vmem:[%s3432_s16 + $0x78] ss:$12 sps:$4 sm:$0xff]  }
  0xc0   : > { %2529 = vmatprep.subr.bf16.mxu1 %v3122_v6  ;;  %v2821_v19 = vld [vmem:[%s3432_s16 + $0x38] ss:$12 sps:$4 sm:$0xff]   ;;  %v2813_v20 = vld [vmem:[%s3432_s16 + $0x94] ss:$12 sps:$4 sm:$0xff]   ;;  %v2822_v21 = vld [vmem:[%s3432_s16 + $0x50] ss:$12 sps:$4 sm:$0xff]  }
  0xc1   : > { %v2815_v22 = vld [vmem:[%s3432_s16 + $0x90] ss:$12 sps:$4 sm:$0xff]   ;;  %v2816_v23 = vld [vmem:[%s3432_s16 + $0xac] ss:$12 sps:$4 sm:$0xff]   ;;  %v2823_v24 = vld [vmem:[%s3432_s16 + $0x68] ss:$12 sps:$4 sm:$0xff]  }
  0xc2   : > { %742 = vmatpush1.bf16.msra.mxu0 %v2800_v8  ;;  %v2818_v25 = vld [vmem:[%s3432_s16 + $0xa8] ss:$12 sps:$4 sm:$0xff]   ;;  %v3499_v26 = vld [vmem:[#allocation12] sm:$0xff]  ;;  %v2826_v31 = vld [vmem:[%s3432_s16 + $0xb0] ss:$12 sps:$4 sm:$0xff]   ;;  %vm3123_vm0 = vmmov 0  }
  0xc3   : > { %743 = vmatprep.subr.bf16.mxu0 %v2801_v9  ;;  %2530 = vmatpush3.bf16.msra.mxu1 %v2820_v15  ;;  %v3501_v27 = vld [vmem:[#allocation12 + $0x8] sm:$0xff]  ;;  %v2825_v30 = vld [vmem:[%s3432_s16 + $0x98] ss:$12 sps:$4 sm:$0xff]   ;;  %vm841_vm1 = vcmask 64512   ;;  %vm961_vm2 = vcmask 1043456   ;;  %s3125_s22 = smov 112  }
  0xc4   : > { %2531 = vmatprep.subr.bf16.mxu1 %v3122_v6  ;;  %v2824_v28 = vld [vmem:[%s3432_s16 + $0x80] ss:$12 sps:$4 sm:$0xff]   ;;  %v578_v29 = vpack.c.bf16 %v3501_v27, %v3499_v26  ;;  %2543 = vmatprep.mubr.msk.bf16.mxu1 %vm3123_vm0, %v3122_v6  ;;  %s3124_s16 = smov 120   ;;  %s3126_s28 = smov 104   ;;  %vm1281_vm3 = vcmask 130112   ;;  %vm1512_vm4 = vcmask 195712  }
  0xc5   : > { %s3127_s20 = smov 8   ;;  %s3128_s11 = smov 16   ;;  %vm1743_vm5 = vcmask 261312  }
  0xc6   : > { %744 = vmatpush1.bf16.msra.mxu0 %v2803_v10  ;;  %s3129_s30 = smov 24   ;;  %s3130_s3 = smov [#allocation12]  }
  0xc7   : > { %745 = vmatprep.subr.bf16.mxu0 %v2804_v11  ;;  %2532 = vmatpush3.bf16.msra.mxu1 %v2821_v19  ;;  %p2742_p11 = scmp.eq.s32.totalorder %s3314_s19, 1 }
  0xc8   : > { %2533 = vmatprep.subr.bf16.mxu1 %v3122_v6 }
  0xca   : > { %746 = vmatpush1.bf16.msra.mxu0 %v2806_v12 }
  0xcb   : > { %747 = vmatprep.subr.bf16.mxu0 %v2807_v13  ;;  %2534 = vmatpush3.bf16.msra.mxu1 %v2822_v21 }
  0xcc   : > { %2535 = vmatprep.subr.bf16.mxu1 %v3122_v6 }
  0xce   : > { %748 = vmatpush1.bf16.msra.mxu0 %v2809_v16 }
  0xcf   : > { %749 = vmatprep.subr.bf16.mxu0 %v2810_v17  ;;  %2536 = vmatpush3.bf16.msra.mxu1 %v2823_v24 }
  0xd0   : > { %2537 = vmatprep.subr.bf16.mxu1 %v3122_v6 }
  0xd2   : > { %750 = vmatpush1.bf16.msra.mxu0 %v2812_v18 }
  0xd3   : > { %751 = vmatprep.subr.bf16.mxu0 %v2813_v20  ;;  %2538 = vmatpush3.bf16.msra.mxu1 %v2824_v28 }
  0xd4   : > { %2539 = vmatprep.subr.bf16.mxu1 %v3122_v6 }
  0xd6   : > { %752 = vmatpush1.bf16.msra.mxu0 %v2815_v22 }
  0xd7   : > { %753 = vmatprep.subr.bf16.mxu0 %v2816_v23  ;;  %2540 = vmatpush3.bf16.msra.mxu1 %v2825_v30 }
  0xd8   : > { %2541 = vmatprep.subr.bf16.mxu1 %v3122_v6 }
  0xda   : > { %754 = vmatpush1.bf16.msra.mxu0 %v2818_v25 }
  0xdb   : > { %2571 = vmatprep.subr.bf16.mxu0 %v3122_v6  ;;  %2542 = vmatpush3.bf16.msra.mxu1 %v2826_v31 }
  0xdc   : > { %2547 = vmatprep.subr.bf16.mxu1 %v3122_v6 }
  0xdd   : > { %772 = vmatmul.mubr.bf16.vlgmr.msra.gmra.mrb[0].mxu0 %v578_v29 }
  0xde   : > { %2573 = vmatprep.mubr.msk.bf16.mxu0 %vm3123_vm0, %v3122_v6  ;;  %2544 = vmatmul.mubr.bf16.vlgmr.msra.gmra.mrb[0].mxu1 %v578_v29 }
  0xdf   : > { %2549 = vmatprep.mubr.msk.bf16.mxu1 %vm3123_vm0, %v3122_v6 }
 0x1b0   : > { %v773_v32 = vpop.f32.mrb[0].mxu0 }
 0x1b1   : > { %v775_v33 = vpop.f32.mrb[1].mxu0  ;;  %v3527_v39 = vpack.c.bf16 %v773_v32, %v773_v32  ;;  %v816_v42 = vpop.f32.mrb[0].mxu1 }
 0x1b2   : > { %v3520_v34 = vpack.c.bf16 %v775_v33, %v775_v33  ;;  %v777_v35 = vpop.f32.mrb[2].mxu0  ;;  %v3542_v43 = vpack.c.bf16 %v816_v42, %v816_v42  ;;  %v2545_v44 = vpop.f32.mrb[1].mxu1 }
 0x1b3   : > { %v779_v36 = vpop.f32.mrb[3].mxu0  ;;  %v3536_v41 = vpack.c.bf16 %v777_v35, %v777_v35  ;;  %v819_v45 = vpop.f32.mrb[2].mxu1 }
 0x1b4   : > { %v846_v37 = vsel %vm841_vm1, %v3520_v34, 0  ;;  %v3525_v38 = vpack.c.bf16 %v779_v36, %v779_v36  ;;  %v2546_v46 = vpop.f32.mrb[3].mxu1  ;;  %v963_v47 = vsel %vm961_vm2, %v3542_v43, 0  ;;  %v3561_v9 = vpack.c.bf16 %v819_v45, %v819_v45 }
 0x1b5   : > { %2548 = vmatpush3.bf16.xpose.msra.mxu1 %v846_v37 }
 0x1b6   : > { %2553 = vmatprep.subr.bf16.mxu1 %v3122_v6  ;;  %v892_v40 = vsel %vm841_vm1, %v3525_v38, 0  ;;  %v1009_v12 = vsel %vm961_vm2, %v3561_v9, 0 }
 0x1bc   : > { %2550 = vmatmul.mubr.msk.bf16.vlgmr.msra.gmra.mrb[4].mxu1 %vm841_vm1, %v3527_v39 }
 0x1bd   : > { %2554 = vmatpush3.bf16.xpose.msra.mxu1 %v892_v40  ;;  %2555 = vmatprep.mubr.msk.bf16.mxu1 %vm3123_vm0, %v3122_v6 }
 0x1be   : > { %2559 = vmatprep.subr.bf16.mxu1 %v3122_v6 }
 0x1c4   : > { %2556 = vmatmul.mubr.msk.bf16.vlgmr.msra.gmra.mrb[8].mxu1 %vm841_vm1, %v3536_v41 }
 0x1c5   : > { %2561 = vmatprep.mubr.msk.bf16.mxu1 %vm3123_vm0, %v3122_v6  ;;  %2560 = vmatpush3.bf16.msra.mxu1 %v963_v47 }
 0x1c6   : > { %2565 = vmatprep.subr.bf16.mxu1 %v3122_v6 }
 0x28f   : > { %v882_v48 = vpop.f32.mrb[4].mxu1 }
 0x290   : > { %v2551_v49 = vpop.f32.mrb[5].mxu1  ;;  %v934_v50 = vsel %vm841_vm1, %v882_v48, -inf }
 0x291   : > { %935 = vmax.xlane.f32.xlu0 %v934_v50  ;;  %v885_v51 = vpop.f32.mrb[6].mxu1 }
 0x292   : > { %v2552_v52 = vpop.f32.mrb[7].mxu1 }
 0x297   : > { %v928_v53 = vpop.f32.mrb[8].mxu1 }
 0x298   : > { %v2557_v54 = vpop.f32.mrb[9].mxu1  ;;  %v937_v55 = vsel %vm841_vm1, %v928_v53, -inf }
 0x299   : > { %938 = vmax.xlane.f32.xlu0 %v937_v55  ;;  %v931_v56 = vpop.f32.mrb[10].mxu1 }
 0x29a   : > { %v2558_v57 = vpop.f32.mrb[11].mxu1 }
 0x2af   : > { %1055 = vrot.lane.b32.xlu0 %v3520_v34, %s3124_s16 }
 0x31e   : > { %v936_v58 = vpop.xlane.xlu0 %935 }
 0x31f   : > { %v940_v59 = vsub.f32 %v882_v48, %v936_v58 }
 0x321   : > { %v942_v60 = vmul.f32 1.442695, %v940_v59 }
 0x323   : > { %2851 = vpow2.f32 %v942_v60 }
 0x326   : > { %v939_v61 = vpop.xlane.xlu0 %938 }
 0x327   : > { %v941_v2 = vsub.f32 %v928_v53, %v939_v61 }
 0x329   : > { %v944_v3 = vmul.f32 1.442695, %v941_v2 }
 0x32a   : > { %v1056_v62 = vpop.permute.xlu0 %1055 }
 0x32b   : > { %v1061_v63 = vsel %vm841_vm1, %v1056_v62, 0  ;;  %2853 = vpow2.f32 %v944_v3 }
 0x32c   : > { %2572 = vmatpush3.bf16.xpose.msra.mxu0 %v1061_v63 }
 0x32d   : > { %v2852_v0 = vpop.eup %2851  ;;  %2583 = vmatprep.subr.bf16.mxu0 %v3122_v6 }
 0x32e   : > { %v946_v1 = vsel %vm841_vm1, %v2852_v0, 0.0 }
 0x32f   : > { %947 = vadd.xlane.f32.xlu1 %v946_v1 }
 0x335   : > { %v2854_v4 = vpop.eup %2853 }
 0x336   : > { %v949_v5 = vsel %vm841_vm1, %v2854_v4, 0.0 }
 0x340   : > { %1105 = vrot.lane.b32.xlu1 %v3525_v38, %s3124_s16 }
 0x364   : > { %950 = vadd.xlane.f32.xlu1 %v949_v5 }
 0x375   : > { %1053 = vrot.lane.b32.xlu1 %v3527_v39, %s3124_s16 }
 0x379   : > { %1103 = vrot.lane.b32.xlu1 %v3536_v41, %s3124_s16 }
 0x3bc   : > { %v948_v7 = vpop.xlane.xlu1 %947 }
 0x3bd   : > { %2855 = vrcp.f32 %v948_v7 }
 0x3c0   : > { %v1106_v13 = vpop.permute.xlu1 %1105 }
 0x3c1   : > { %v1111_v19 = vsel %vm841_vm1, %v1106_v13, 0 }
 0x3c7   : > { %v2856_v8 = vpop.eup %2855 }
 0x3c8   : > { %v954_v10 = vmul.f32 %v2856_v8, %v2852_v0 }
 0x3ca   : > { %v956_v11 = vpack.c.bf16 %v954_v10, %v954_v10 }
 0x3cc   : > { %2562 = vmatmul.mubr.msk.bf16.vlgmr.msra.gmra.mrb[12].mxu1 %vm841_vm1, %v956_v11 }
 0x3cd   : > { %2566 = vmatpush3.bf16.msra.mxu1 %v1009_v12  ;;  %2567 = vmatprep.mubr.msk.bf16.mxu1 %vm3123_vm0, %v3122_v6 }
 0x3ce   : > { %2577 = vmatprep.subr.bf16.mxu1 %v3122_v6 }
 0x3f1   : > { %v951_v14 = vpop.xlane.xlu1 %950 }
 0x3f2   : > { %2857 = vrcp.f32 %v951_v14 }
 0x3f5   : > { %v1054_v15 = vpop.permute.xlu1 %1053 }
 0x3f6   : > { %2574 = vmatmul.mubr.msk.bf16.vlgmr.msra.gmra.mrb[4].mxu0 %vm841_vm1, %v1054_v15 }
 0x3f7   : > { %2585 = vmatprep.mubr.msk.bf16.mxu0 %vm3123_vm0, %v3122_v6 }
 0x3f9   : > { %v1104_v20 = vpop.permute.xlu1 %1103 }
 0x3fc   : > { %v2858_v16 = vpop.eup %2857 }
 0x3fd   : > { %v955_v17 = vmul.f32 %v2858_v16, %v2854_v4 }
 0x3ff   : > { %v957_v18 = vpack.c.bf16 %v955_v17, %v955_v17 }
 0x401   : > { %2568 = vmatmul.mubr.msk.bf16.vlgmr.msra.gmra.mrb[16].mxu1 %vm841_vm1, %v957_v18 }
 0x402   : > { %2578 = vmatpush3.bf16.xpose.msra.mxu1 %v1111_v19  ;;  %2579 = vmatprep.mubr.msk.bf16.mxu1 %vm3123_vm0, %v3122_v6 }
 0x403   : > { %2589 = vmatprep.subr.bf16.mxu1 %v3122_v6 }
 0x409   : > { %2580 = vmatmul.mubr.msk.bf16.vlgmr.msra.gmra.mrb[20].mxu1 %vm841_vm1, %v1104_v20 }
 0x40a   : > { %2591 = vmatprep.mubr.msk.bf16.mxu1 %vm3123_vm0, %v3122_v6 }
 0x49f   : > { %v999_v21 = vpop.f32.mrb[12].mxu1 }
 0x4a0   : > { %1051 = vst.msk [vmem:[#allocation2] sm:$0xff] %vm841_vm1, %v999_v21  ;;  %v2563_v22 = vpop.f32.mrb[13].mxu1 }
 0x4a1   : > { %v1002_v23 = vpop.f32.mrb[14].mxu1 }
 0x4a2   : > { %v2564_v24 = vpop.f32.mrb[15].mxu1 }
 0x4c9   : > { %v1097_v25 = vpop.f32.mrb[4].mxu0 }
 0x4ca   : > { %v2575_v28 = vpop.f32.mrb[5].mxu0  ;;  %v1153_v29 = vsel %vm841_vm1, %v1097_v25, -inf }
 0x4cb   : > { %1154 = vmax.xlane.f32.xlu0 %v1153_v29  ;;  %v1100_v30 = vpop.f32.mrb[6].mxu0 }
 0x4cc   : > { %v2576_v31 = vpop.f32.mrb[7].mxu0 }
 0x4d4   : > { %v1045_v32 = vpop.f32.mrb[16].mxu1 }
 0x4d5   : > { %1052 = vst.msk [vmem:[#allocation2 + $0x8] sm:$0xff] %vm841_vm1, %v1045_v32  ;;  %v2569_v33 = vpop.f32.mrb[17].mxu1 }
 0x4d6   : > { %v1048_v35 = vpop.f32.mrb[18].mxu1 }
 0x4d7   : > { %v2570_v36 = vpop.f32.mrb[19].mxu1 }
 0x4dc   : > { %v1147_v37 = vpop.f32.mrb[20].mxu1 }
 0x4dd   : > { %v2581_v40 = vpop.f32.mrb[21].mxu1  ;;  %v1156_v42 = vsel %vm841_vm1, %v1147_v37, -inf }
 0x4de   : > { %1157 = vmax.xlane.f32.xlu1 %v1156_v42  ;;  %v1150_v44 = vpop.f32.mrb[22].mxu1 }
 0x4df   : > { %v2582_v45 = vpop.f32.mrb[23].mxu1 }
 0x4ef   : > { %1225 = vrot.lane.b32.xlu1 %v3561_v9, %s3124_s16 }
 0x4f3   : > { %1286 = vrot.lane.b32.xlu1 %v3520_v34, %s3125_s22 }
 0x4f7   : > { %1336 = vrot.lane.b32.xlu1 %v3525_v38, %s3125_s22 }
 0x4fb   : > { %1334 = vrot.lane.b32.xlu1 %v3536_v41, %s3125_s22 }
 0x558   : > { %v1155_v46 = vpop.xlane.xlu0 %1154 }
 0x559   : > { %v1159_v47 = vsub.f32 %v1097_v25, %v1155_v46 }
 0x55b   : > { %v1161_v48 = vmul.f32 1.442695, %v1159_v47 }
 0x55d   : > { %2859 = vpow2.f32 %v1161_v48 }
 0x567   : > { %v2860_v49 = vpop.eup %2859 }
 0x568   : > { %v1165_v50 = vsel %vm841_vm1, %v2860_v49, 0.0 }
 0x569   : > { %1166 = vadd.xlane.f32.xlu0 %v1165_v50 }
 0x56b   : > { %v1158_v51 = vpop.xlane.xlu1 %1157 }
 0x56c   : > { %v1160_v52 = vsub.f32 %v1147_v37, %v1158_v51 }
 0x56e   : > { %v1163_v53 = vmul.f32 1.442695, %v1160_v52 }
 0x56f   : > { %v1226_v54 = vpop.permute.xlu1 %1225 }
 0x570   : > { %2861 = vpow2.f32 %v1163_v53  ;;  %v1231_v55 = vsel %vm961_vm2, %v1226_v54, 0 }
 0x571   : > { %2590 = vmatpush3.bf16.msra.mxu1 %v1231_v55 }
 0x572   : > { %2601 = vmatprep.subr.bf16.mxu1 %v3122_v6 }
 0x573   : > { %v1287_v0 = vpop.permute.xlu1 %1286 }
 0x574   : > { %v1292_v5 = vsel %vm841_vm1, %v1287_v0, 0 }
 0x577   : > { %v1337_v4 = vpop.permute.xlu1 %1336 }
 0x578   : > { %v1342_v8 = vsel %vm841_vm1, %v1337_v4, 0 }
 0x57a   : > { %v2862_v56 = vpop.eup %2861 }
 0x57b   : > { %v1168_v57 = vsel %vm841_vm1, %v2862_v56, 0.0  ;;  %v1335_v11 = vpop.permute.xlu1 %1334 }
 0x57c   : > { %1169 = vadd.xlane.f32.xlu0 %v1168_v57 }
 0x592   : > { %1177 = vrot.lane.b32.xlu0 %v3542_v43, %s3124_s16 }
 0x596   : > { %1284 = vrot.lane.b32.xlu0 %v3527_v39, %s3125_s22 }
 0x5f6   : > { %v1167_v58 = vpop.xlane.xlu0 %1166 }
 0x5f7   : > { %2863 = vrcp.f32 %v1167_v58 }
 0x601   : > { %v2864_v59 = vpop.eup %2863 }
 0x602   : > { %v1173_v61 = vmul.f32 %v2864_v59, %v2860_v49 }
 0x604   : > { %v1175_v1 = vpack.c.bf16 %v1173_v61, %v1173_v61 }
 0x609   : > { %v1170_v60 = vpop.xlane.xlu0 %1169 }
 0x60a   : > { %2865 = vrcp.f32 %v1170_v60 }
 0x60d   : > { %v1178_v62 = vpop.permute.xlu0 %1177 }
 0x60e   : > { %v1183_v63 = vsel %vm961_vm2, %v1178_v62, 0 }
 0x60f   : > { %2584 = vmatpush3.bf16.msra.mxu0 %v1183_v63 }
 0x610   : > { %2595 = vmatprep.subr.bf16.mxu0 %v3122_v6 }
 0x611   : > { %v1285_v10 = vpop.permute.xlu0 %1284 }
 0x612   : > { %2586 = vmatmul.mubr.msk.bf16.vlgmr.msra.gmra.mrb[8].mxu0 %vm841_vm1, %v1175_v1 }
 0x613   : > { %2597 = vmatprep.mubr.msk.bf16.mxu0 %vm3123_vm0, %v3122_v6 }
 0x614   : > { %v2866_v2 = vpop.eup %2865 }
 0x615   : > { %v1174_v3 = vmul.f32 %v2866_v2, %v2862_v56 }
 0x617   : > { %v1176_v7 = vpack.c.bf16 %v1174_v3, %v1174_v3 }
 0x618   : > { %2596 = vmatpush3.bf16.xpose.msra.mxu0 %v1292_v5 }
 0x619   : > { %2592 = vmatmul.mubr.msk.bf16.vlgmr.msra.gmra.mrb[24].mxu1 %vm841_vm1, %v1176_v7  ;;  %2607 = vmatprep.subr.bf16.mxu0 %v3122_v6 }
 0x61a   : > { %2602 = vmatpush3.bf16.xpose.msra.mxu1 %v1342_v8  ;;  %2603 = vmatprep.mubr.msk.bf16.mxu1 %vm3123_vm0, %v3122_v6 }
 0x61b   : > { %2613 = vmatprep.subr.bf16.mxu1 %v3122_v6 }
 0x61f   : > { %2598 = vmatmul.mubr.msk.bf16.vlgmr.msra.gmra.mrb[12].mxu0 %vm841_vm1, %v1285_v10 }
 0x620   : > { %2609 = vmatprep.mubr.msk.bf16.mxu0 %vm3123_vm0, %v3122_v6 }
 0x621   : > { %2604 = vmatmul.mubr.msk.bf16.vlgmr.msra.gmra.mrb[28].mxu1 %vm841_vm1, %v1335_v11 }
 0x622   : > { %2615 = vmatprep.mubr.msk.bf16.mxu1 %vm3123_vm0, %v3122_v6 }
 0x6e5   : > { %v3618_v12 = vpop.f32.mrb[8].mxu0 }
 0x6e6   : > { %v2587_v13 = vpop.f32.mrb[9].mxu0 }
 0x6e7   : > { %v1222_v14 = vpop.f32.mrb[10].mxu0 }
 0x6e8   : > { %v2588_v15 = vpop.f32.mrb[11].mxu0 }
 0x6ec   : > { %v3620_v16 = vpop.f32.mrb[24].mxu1 }
 0x6ed   : > { %v2593_v17 = vpop.f32.mrb[25].mxu1 }
 0x6ee   : > { %v1270_v18 = vpop.f32.mrb[26].mxu1 }
 0x6ef   : > { %v2594_v19 = vpop.f32.mrb[27].mxu1 }
 0x6f2   : > { %v1328_v20 = vpop.f32.mrb[12].mxu0 }
 0x6f3   : > { %v2599_v21 = vpop.f32.mrb[13].mxu0  ;;  %v1384_v22 = vsel %vm841_vm1, %v1328_v20, -inf }
 0x6f4   : > { %1385 = vmax.xlane.f32.xlu0 %v1384_v22  ;;  %v1331_v23 = vpop.f32.mrb[14].mxu0  ;;  %v1378_v24 = vpop.f32.mrb[28].mxu1 }
 0x6f5   : > { %v2600_v25 = vpop.f32.mrb[15].mxu0  ;;  %v2605_v28 = vpop.f32.mrb[29].mxu1  ;;  %v1387_v29 = vsel %vm841_vm1, %v1378_v24, -inf }
 0x6f6   : > { %1388 = vmax.xlane.f32.xlu1 %v1387_v29  ;;  %v1381_v30 = vpop.f32.mrb[30].mxu1 }
 0x6f7   : > { %v2606_v31 = vpop.f32.mrb[31].mxu1 }
 0x707   : > { %1456 = vrot.lane.b32.xlu1 %v3561_v9, %s3125_s22 }
 0x70b   : > { %1517 = vrot.lane.b32.xlu1 %v3520_v34, %s3126_s28 }
 0x70f   : > { %1567 = vrot.lane.b32.xlu1 %v3525_v38, %s3126_s28 }
 0x713   : > { %1565 = vrot.lane.b32.xlu1 %v3536_v41, %s3126_s28 }
 0x781   : > { %v1386_v32 = vpop.xlane.xlu0 %1385 }
 0x782   : > { %v1390_v33 = vsub.f32 %v1328_v20, %v1386_v32 }
 0x783   : > { %v1389_v35 = vpop.xlane.xlu1 %1388 }
 0x784   : > { %v1392_v36 = vmul.f32 1.442695, %v1390_v33  ;;  %v1391_v37 = vsub.f32 %v1378_v24, %v1389_v35 }
 0x786   : > { %2867 = vpow2.f32 %v1392_v36  ;;  %v1394_v40 = vmul.f32 1.442695, %v1391_v37 }
 0x787   : > { %v1457_v42 = vpop.permute.xlu1 %1456 }
 0x788   : > { %2869 = vpow2.f32 %v1394_v40  ;;  %v1462_v44 = vsel %vm961_vm2, %v1457_v42, 0 }
 0x789   : > { %2614 = vmatpush3.bf16.msra.mxu1 %v1462_v44 }
 0x78a   : > { %2625 = vmatprep.subr.bf16.mxu1 %v3122_v6 }
 0x78b   : > { %v1518_v51 = vpop.permute.xlu1 %1517 }
 0x78f   : > { %v1568_v56 = vpop.permute.xlu1 %1567 }
 0x790   : > { %v2868_v34 = vpop.eup %2867  ;;  %v1573_v58 = vsel %vm841_vm1, %v1568_v56, 0 }
 0x791   : > { %v1396_v38 = vsel %vm841_vm1, %v2868_v34, 0.0 }
 0x792   : > { %v2870_v45 = vpop.eup %2869  ;;  %1397 = vadd.xlane.f32.xlu0 %v1396_v38 }
 0x793   : > { %v1399_v41 = vsel %vm841_vm1, %v2870_v45, 0.0  ;;  %v1566_v60 = vpop.permute.xlu1 %1565 }
 0x796   : > { %1400 = vadd.xlane.f32.xlu0 %v1399_v41  ;;  %v2827_v41 = vld [vmem:[%s3438_s21] sm:$0xff]  }
 0x7ac   : > { %1408 = vrot.lane.b32.xlu0 %v3542_v43, %s3125_s22 }
 0x7b0   : > { %1515 = vrot.lane.b32.xlu0 %v3527_v39, %s3126_s28  ;;  %v1523_v39 = vsel %vm841_vm1, %v1518_v51, 0  ;;  %v2833_v51 = vld [vmem:[%s3438_s21 + $0x30] sm:$0xff]  }
 0x81f   : > { %v1398_v46 = vpop.xlane.xlu0 %1397 }
 0x820   : > { %2871 = vrcp.f32 %v1398_v46  ;;  %v2828_v46 = vld [vmem:[%s3438_s21 + $0x8] sm:$0xff]  }
 0x823   : > { %v1401_v47 = vpop.xlane.xlu0 %1400 }
 0x824   : > { %2873 = vrcp.f32 %v1401_v47  ;;  %v2829_v47 = vld [vmem:[%s3438_s21 + $0x10] sm:$0xff]  }
 0x827   : > { %v1409_v48 = vpop.permute.xlu0 %1408 }
 0x828   : > { %v1414_v49 = vsel %vm961_vm2, %v1409_v48, 0  ;;  %v2830_v48 = vld [vmem:[%s3438_s21 + $0x18] sm:$0xff]  }
 0x829   : > { %2608 = vmatpush3.bf16.msra.mxu0 %v1414_v49  ;;  %v2831_v49 = vld [vmem:[%s3438_s21 + $0x20] sm:$0xff]  }
 0x82a   : > { %v2872_v50 = vpop.eup %2871  ;;  %2619 = vmatprep.subr.bf16.mxu0 %v3122_v6 }
 0x82b   : > { %v1404_v52 = vmul.f32 %v2872_v50, %v2868_v34  ;;  %v1516_v59 = vpop.permute.xlu0 %1515  ;;  %v2832_v50 = vld [vmem:[%s3438_s21 + $0x28] sm:$0xff]  }
 0x82d   : > { %v1406_v53 = vpack.c.bf16 %v1404_v52, %v1404_v52  ;;  %v2834_v52 = vld [vmem:[%s3438_s21 + $0x38] sm:$0xff]  }
 0x82e   : > { %v2874_v54 = vpop.eup %2873 }
 0x82f   : > { %v1405_v55 = vmul.f32 %v2874_v54, %v2870_v45  ;;  %2610 = vmatmul.mubr.msk.bf16.vlgmr.msra.gmra.mrb[16].mxu0 %vm841_vm1, %v1406_v53 }
 0x830   : > { %2621 = vmatprep.mubr.msk.bf16.mxu0 %vm3123_vm0, %v3122_v6 }
 0x831   : > { %v1407_v57 = vpack.c.bf16 %v1405_v55, %v1405_v55 }
 0x832   : > { %2620 = vmatpush3.bf16.xpose.msra.mxu0 %v1523_v39 }
 0x833   : > { %2616 = vmatmul.mubr.msk.bf16.vlgmr.msra.gmra.mrb[32].mxu1 %vm841_vm1, %v1407_v57  ;;  %2631 = vmatprep.subr.bf16.mxu0 %v3122_v6 }
 0x834   : > { %2626 = vmatpush3.bf16.xpose.msra.mxu1 %v1573_v58  ;;  %2627 = vmatprep.mubr.msk.bf16.mxu1 %vm3123_vm0, %v3122_v6 }
 0x835   : > { %2637 = vmatprep.subr.bf16.mxu1 %v3122_v6 }
 0x839   : > { %2622 = vmatmul.mubr.msk.bf16.vlgmr.msra.gmra.mrb[20].mxu0 %vm841_vm1, %v1516_v59 }
 0x83a   : > { %2633 = vmatprep.mubr.msk.bf16.mxu0 %vm3123_vm0, %v3122_v6 }
 0x83b   : > { %2628 = vmatmul.mubr.msk.bf16.vlgmr.msra.gmra.mrb[36].mxu1 %vm841_vm1, %v1566_v60 }
 0x83c   : > { %2639 = vmatprep.mubr.msk.bf16.mxu1 %vm3123_vm0, %v3122_v6 }
 0x902   : > { %v1450_v61 = vpop.f32.mrb[16].mxu0 }
 0x903   : > { %v2611_v62 = vpop.f32.mrb[17].mxu0 }
 0x904   : > { %v1453_v63 = vpop.f32.mrb[18].mxu0 }
 0x905   : > { %v2612_v0 = vpop.f32.mrb[19].mxu0 }
 0x906   : > { %v1498_v1 = vpop.f32.mrb[32].mxu1 }
 0x907   : > { %v2617_v2 = vpop.f32.mrb[33].mxu1 }
 0x908   : > { %v1501_v3 = vpop.f32.mrb[34].mxu1  ;;  %v2836_v2 = vld [vmem:[%s3440_s17 + $0x8] sm:$0xff]  }
 0x909   : > { %v2618_v4 = vpop.f32.mrb[35].mxu1  ;;  %v2837_v3 = vld [vmem:[%s3440_s17 + $0x10] sm:$0xff]  }
 0x90a   : > { %v2838_v4 = vld [vmem:[%s3440_s17 + $0x18] sm:$0xff]  }
 0x90c   : > { %v1559_v5 = vpop.f32.mrb[20].mxu0 }
 0x90d   : > { %v2623_v7 = vpop.f32.mrb[21].mxu0  ;;  %v1615_v8 = vsel %vm841_vm1, %v1559_v5, -inf }
 0x90e   : > { %1616 = vmax.xlane.f32.xlu0 %v1615_v8  ;;  %v1562_v10 = vpop.f32.mrb[22].mxu0  ;;  %v1609_v11 = vpop.f32.mrb[36].mxu1  ;;  %v2840_v7 = vld [vmem:[%s3440_s17 + $0x28] sm:$0xff]   ;;  %v2841_v8 = vld [vmem:[%s3440_s17 + $0x30] sm:$0xff]  }
 0x90f   : > { %v2624_v13 = vpop.f32.mrb[23].mxu0  ;;  %v2629_v14 = vpop.f32.mrb[37].mxu1  ;;  %v1618_v15 = vsel %vm841_vm1, %v1609_v11, -inf  ;;  %v2842_v10 = vld [vmem:[%s3440_s17 + $0x38] sm:$0xff]  }
 0x910   : > { %1619 = vmax.xlane.f32.xlu1 %v1618_v15  ;;  %v1612_v17 = vpop.f32.mrb[38].mxu1  ;;  %v2844_v13 = vld [vmem:[%s3470_s10 + $0x8] sm:$0xff]   ;;  %v2845_v14 = vld [vmem:[%s3470_s10 + $0x10] sm:$0xff]   ;;  %v2846_v15 = vld [vmem:[%s3470_s10 + $0x18] sm:$0xff]  }
 0x911   : > { %v2630_v18 = vpop.f32.mrb[39].mxu1  ;;  %v2847_v17 = vld [vmem:[%s3470_s10 + $0x20] sm:$0xff]  }
 0x912   : > { %v2848_v18 = vld [vmem:[%s3470_s10 + $0x28] sm:$0xff]  }
 0x921   : > { %1687 = vrot.lane.b32.xlu1 %v3561_v9, %s3126_s28 }
 0x925   : > { %1275 = vrot.lane.b32.xlu1 %v3618_v12, %s3127_s20 }
 0x929   : > { %1277 = vrot.lane.b32.xlu1 %v3620_v16, %s3127_s20 }
 0x92d   : > { %1508 = vrot.lane.b32.xlu1 %v1498_v1, %s3128_s11  ;;  %v2835_v1 = vld [vmem:[%s3440_s17] sm:$0xff]  }
 0x99b   : > { %v1617_v19 = vpop.xlane.xlu0 %1616 }
 0x99c   : > { %v1621_v20 = vsub.f32 %v1559_v5, %v1617_v19  ;;  %v2839_v5 = vld [vmem:[%s3440_s17 + $0x20] sm:$0xff]  }
 0x99d   : > { %v1620_v21 = vpop.xlane.xlu1 %1619 }
 0x99e   : > { %v1623_v22 = vmul.f32 1.442695, %v1621_v20  ;;  %v1622_v23 = vsub.f32 %v1609_v11, %v1620_v21  ;;  %v2843_v11 = vld [vmem:[%s3470_s10] sm:$0xff]  }
 0x9a0   : > { %2875 = vpow2.f32 %v1623_v22  ;;  %v1625_v24 = vmul.f32 1.442695, %v1622_v23 }
 0x9a1   : > { %v1688_v25 = vpop.permute.xlu1 %1687 }
 0x9a2   : > { %2877 = vpow2.f32 %v1625_v24  ;;  %v1693_v9 = vsel %vm961_vm2, %v1688_v25, 0 }
 0x9a3   : > { %2638 = vmatpush3.bf16.msra.mxu1 %v1693_v9 }
 0x9a4   : > { %2663 = vmatprep.subr.bf16.mxu1 %v3122_v6 }
 0x9a5   : > { %v1276_v12 = vpop.permute.xlu1 %1275 }
 0x9a6   : > { %1282 = vst.msk [vmem:[#allocation2] sm:$0xff] %vm1281_vm3, %v1276_v12 }
 0x9a9   : > { %v1278_v16 = vpop.permute.xlu1 %1277 }
 0x9aa   : > { %v2876_v28 = vpop.eup %2875  ;;  %1283 = vst.msk [vmem:[#allocation2 + $0x8] sm:$0xff] %vm1281_vm3, %v1278_v16 }
 0x9ab   : > { %v1627_v29 = vsel %vm841_vm1, %v2876_v28, 0.0 }
 0x9ac   : > { %v2878_v30 = vpop.eup %2877  ;;  %1628 = vadd.xlane.f32.xlu0 %v1627_v29 }
 0x9ad   : > { %v1509_v31 = vpop.permute.xlu1 %1508  ;;  %v1630_v32 = vsel %vm841_vm1, %v2878_v30, 0.0 }
 0x9ae   : > { %1514 = vst.msk [vmem:[#allocation2 + $0x8] sm:$0xff] %vm1512_vm4, %v1509_v31 }
 0x9b0   : > { %1631 = vadd.xlane.f32.xlu0 %v1630_v32 }
 0x9c6   : > { %1639 = vrot.lane.b32.xlu0 %v3542_v43, %s3126_s28 }
 0x9ca   : > { %1506 = vrot.lane.b32.xlu0 %v1450_v61, %s3128_s11 }
 0xa39   : > { %v1629_v33 = vpop.xlane.xlu0 %1628 }
 0xa3a   : > { %2879 = vrcp.f32 %v1629_v33 }
 0xa3d   : > { %v1632_v35 = vpop.xlane.xlu0 %1631 }
 0xa3e   : > { %2881 = vrcp.f32 %v1632_v35 }
 0xa41   : > { %v1640_v36 = vpop.permute.xlu0 %1639 }
 0xa42   : > { %v1645_v37 = vsel %vm961_vm2, %v1640_v36, 0 }
 0xa43   : > { %2632 = vmatpush3.bf16.msra.mxu0 %v1645_v37 }
 0xa44   : > { %v2880_v40 = vpop.eup %2879  ;;  %2643 = vmatprep.subr.bf16.mxu0 %v3122_v6 }
 0xa45   : > { %v1635_v42 = vmul.f32 %v2880_v40, %v2876_v28  ;;  %v1507_v44 = vpop.permute.xlu0 %1506 }
 0xa46   : > { %1513 = vst.msk [vmem:[#allocation2] sm:$0xff] %vm1512_vm4, %v1507_v44 }
 0xa47   : > { %v1637_v43 = vpack.c.bf16 %v1635_v42, %v1635_v42 }
 0xa48   : > { %v2882_v34 = vpop.eup %2881 }
 0xa49   : > { %v1636_v38 = vmul.f32 %v2882_v34, %v2878_v30  ;;  %2634 = vmatmul.mubr.msk.bf16.vlgmr.msra.gmra.mrb[24].mxu0 %vm841_vm1, %v1637_v43 }
 0xa4a   : > { %2659 = vmatprep.mubr.msk.bf16.mxu0 %vm3123_vm0, %v3122_v6  ;;  %2644 = vmatpush3.bf16.msra.mxu0 %v2827_v41 }
 0xa4b   : > { %v1638_v45 = vpack.c.bf16 %v1636_v38, %v1636_v38  ;;  %2645 = vmatprep.subr.bf16.mxu0 %v3122_v6 }
 0xa4d   : > { %2640 = vmatmul.mubr.msk.bf16.vlgmr.msra.gmra.mrb[40].mxu1 %vm841_vm1, %v1638_v45 }
 0xa4e   : > { %2679 = vmatprep.mubr.msk.bf16.mxu1 %vm3123_vm0, %v3122_v6  ;;  %2646 = vmatpush3.bf16.msra.mxu0 %v2828_v46 }
 0xa4f   : > { %2647 = vmatprep.subr.bf16.mxu0 %v3122_v6  ;;  %2664 = vmatpush3.bf16.msra.mxu1 %v2835_v1 }
 0xa50   : > { %2665 = vmatprep.subr.bf16.mxu1 %v3122_v6 }
 0xa52   : > { %2648 = vmatpush3.bf16.msra.mxu0 %v2829_v47 }
 0xa53   : > { %2649 = vmatprep.subr.bf16.mxu0 %v3122_v6  ;;  %2666 = vmatpush3.bf16.msra.mxu1 %v2836_v2 }
 0xa54   : > { %2667 = vmatprep.subr.bf16.mxu1 %v3122_v6 }
 0xa56   : > { %2650 = vmatpush3.bf16.msra.mxu0 %v2830_v48  ;;  %v2425_v48 = vld [vmem:[%s555_s12] ss:$0 sm:$0xff] }
 0xa57   : > { %2651 = vmatprep.subr.bf16.mxu0 %v3122_v6  ;;  %2668 = vmatpush3.bf16.msra.mxu1 %v2837_v3 }
 0xa58   : > { %2669 = vmatprep.subr.bf16.mxu1 %v3122_v6 }
 0xa5a   : > { %2652 = vmatpush3.bf16.msra.mxu0 %v2831_v49 }
 0xa5b   : > { %2653 = vmatprep.subr.bf16.mxu0 %v3122_v6  ;;  %2670 = vmatpush3.bf16.msra.mxu1 %v2838_v4 }
 0xa5c   : > { %2671 = vmatprep.subr.bf16.mxu1 %v3122_v6 }
 0xa5e   : > { %2654 = vmatpush3.bf16.msra.mxu0 %v2832_v50 }
 0xa5f   : > { %2655 = vmatprep.subr.bf16.mxu0 %v3122_v6  ;;  %2672 = vmatpush3.bf16.msra.mxu1 %v2839_v5 }
 0xa60   : > { %2673 = vmatprep.subr.bf16.mxu1 %v3122_v6 }
 0xa62   : > { %2656 = vmatpush3.bf16.msra.mxu0 %v2833_v51  ;;  %v2426_v51 = vld [vmem:[%s558_s27] ss:$0 sm:$0xff] }
 0xa63   : > { %2657 = vmatprep.subr.bf16.mxu0 %v3122_v6  ;;  %2674 = vmatpush3.bf16.msra.mxu1 %v2840_v7 }
 0xa64   : > { %2675 = vmatprep.subr.bf16.mxu1 %v3122_v6 }
 0xa66   : > { %2658 = vmatpush3.bf16.msra.mxu0 %v2834_v52 }
 0xa67   : > { %2683 = vmatprep.subr.bf16.mxu0 %v3122_v6  ;;  %2676 = vmatpush3.bf16.msra.mxu1 %v2841_v8 }
 0xa68   : > { %2677 = vmatprep.subr.bf16.mxu1 %v3122_v6 }
 0xa6b   : > { %2678 = vmatpush3.bf16.msra.mxu1 %v2842_v10 }
 0xb1c   : > { %v1681_v53 = vpop.f32.mrb[24].mxu0 }
 0xb1d   : > { %1737 = vrot.lane.b32.xlu0 %v1681_v53, %s3129_s30  ;;  %v2635_v54 = vpop.f32.mrb[25].mxu0 }
 0xb1e   : > { %v1684_v55 = vpop.f32.mrb[26].mxu0 }
 0xb1f   : > { %v2636_v56 = vpop.f32.mrb[27].mxu0 }
 0xb20   : > { %v1729_v39 = vpop.f32.mrb[40].mxu1 }
 0xb21   : > { %1739 = vrot.lane.b32.xlu1 %v1729_v39, %s3129_s30  ;;  %v2641_v57 = vpop.f32.mrb[41].mxu1  ;;  %v2849_v39 = vld [vmem:[%s3470_s10 + $0x30] sm:$0xff]  }
 0xb22   : > { %v1732_v58 = vpop.f32.mrb[42].mxu1  ;;  %v2850_v57 = vld [vmem:[%s3470_s10 + $0x38] sm:$0xff]   ;;  %s2178_s10 = sshll.u32 %s3130_s3, 4  ;;  %s2179_s10 = int_to_ptr.vmem [resolvable:$true] %s2178_s10 }
 0xb23   : > { %v2642_v59 = vpop.f32.mrb[43].mxu1  ;;  %v2427_v58 = vld [vmem:[%s552_s26] ss:$0 sm:$0xff]  ;;  %s3035_s16 = scalar_lea.vmem %s2179_s10, 256  ;;  %p3042_p7 = scmp.lt.s32.totalorder %s2179_s10, %s2179_s10 }
 0xb24   : > { %p3036_p8 = scmp.ne.s32.totalorder %s2179_s10, %s3035_s16  ;;  %p3043_p2 = scmp.lt.s32.totalorder %s3035_s16, %s3035_s16 }
 0xb26   : > { %p3037_p0 = pnand %p3036_p8, %p2742_p11  ;;  %p3044_p1 = por %p3043_p2, %p3042_p7 }
 0xb28   : > { %p3038_p5 = pneg %p3037_p0 }
 0xb2a   : > { %p3045_p13 = pnand %p3044_p1, %p3038_p5 }
 0xb8f   : > { %v1738_v60 = vpop.permute.xlu0 %1737 }
 0xb90   : > { %1744 = vst.msk [vmem:[#allocation2] sm:$0xff] %vm1743_vm5, %v1738_v60 }
 0xb93   : > { %v1740_v61 = vpop.permute.xlu1 %1739 }
 0xb94   : > { %1745 = vst.msk [vmem:[#allocation2 + $0x8] sm:$0xff] %vm1743_vm5, %v1740_v61 }
 0xb97   : > { %v1746_v62 = vld [vmem:[#allocation2] sm:$0xff] }
 0xb9b   : > { %v1747_v63 = vld [vmem:[#allocation2 + $0x8] sm:$0xff] }
 0xb9c   : > { %v1748_v0 = vpack.c.bf16 %v1747_v63, %v1746_v62 }
 0xb9e   : > { %2660 = vmatmul.mubr.bf16.vlgmr.msra.gmra.mrb[28].mxu0 %v1748_v0 }
 0xb9f   : > { %2699 = vmatprep.mubr.msk.bf16.mxu0 %vm3123_vm0, %v3122_v6  ;;  %2684 = vmatpush3.bf16.msra.mxu0 %v2843_v11 }
 0xba0   : > { %2685 = vmatprep.subr.bf16.mxu0 %v3122_v6 }
 0xba3   : > { %2686 = vmatpush3.bf16.msra.mxu0 %v2844_v13 }
 0xba4   : > { %2687 = vmatprep.subr.bf16.mxu0 %v3122_v6 }
 0xba7   : > { %2688 = vmatpush3.bf16.msra.mxu0 %v2845_v14 }
 0xba8   : > { %2689 = vmatprep.subr.bf16.mxu0 %v3122_v6 }
 0xbab   : > { %2690 = vmatpush3.bf16.msra.mxu0 %v2846_v15 }
 0xbac   : > { %2691 = vmatprep.subr.bf16.mxu0 %v3122_v6 }
 0xbaf   : > { %2692 = vmatpush3.bf16.msra.mxu0 %v2847_v17 }
 0xbb0   : > { %2693 = vmatprep.subr.bf16.mxu0 %v3122_v6 }
 0xbb3   : > { %2694 = vmatpush3.bf16.msra.mxu0 %v2848_v18 }
 0xbb4   : > { %2695 = vmatprep.subr.bf16.mxu0 %v3122_v6 }
 0xbb7   : > { %2696 = vmatpush3.bf16.msra.mxu0 %v2849_v39 }
 0xbb8   : > { %2697 = vmatprep.subr.bf16.mxu0 %v3122_v6 }
 0xbbb   : > { %2698 = vmatpush3.bf16.msra.mxu0 %v2850_v57 }
 0xc71   : > { %v1847_v19 = vpop.f32.mrb[28].mxu0 }
 0xc72   : > { %v1854_v20 = vadd.f32 %v1847_v19, %v3499_v26  ;;  %v2661_v21 = vpop.f32.mrb[29].mxu0 }
 0xc73   : > { %v1850_v22 = vpop.f32.mrb[30].mxu0 }
 0xc74   : > { %v1855_v23 = vadd.f32 %v1850_v22, %v3501_v27  ;;  %v2662_v24 = vpop.f32.mrb[31].mxu0  ;;  %v1865_v25 = vmul.f32 %v1854_v20, %v1854_v20 }
 0xc76   : > { %v1856_v9 = vadd.f32 %v1855_v23, %v1854_v20  ;;  %v1866_v12 = vmul.f32 %v1855_v23, %v1855_v23 }
 0xc78   : > { %v1857_v16 = vrot.slane %v1856_v9, 4  ;;  %v1867_v28 = vadd.f32 %v1866_v12, %v1865_v25 }
 0xc7a   : > { %v1858_v29 = vadd.f32 %v1857_v16, %v1856_v9  ;;  %v1868_v30 = vrot.slane %v1867_v28, 4 }
 0xc7c   : > { %v1859_v31 = vrot.slane %v1858_v29, 2  ;;  %v1869_v32 = vadd.f32 %v1868_v30, %v1867_v28 }
 0xc7e   : > { %v1860_v33 = vadd.f32 %v1859_v31, %v1858_v29  ;;  %v1870_v35 = vrot.slane %v1869_v32, 2 }
 0xc80   : > { %v1861_v36 = vrot.slane %v1860_v33, 1  ;;  %v1871_v37 = vadd.f32 %v1870_v35, %v1869_v32 }
 0xc82   : > { %v1862_v26 = vadd.f32 %v1861_v36, %v1860_v33  ;;  %v1872_v40 = vrot.slane %v1871_v37, 1 }
 0xc84   : > { %v1864_v42 = vmul.f32 0.0625, %v1862_v26  ;;  %v1873_v27 = vadd.f32 %v1872_v40, %v1871_v37  ;;  %v2444_v26 = vld [vmem:[%s561_s9] ss:$0 sm:$0xff] }
 0xc86   : > { %v1874_v44 = vmul.f32 0.0625, %v1873_v27  ;;  %v1875_v43 = vmul.f32 %v1864_v42, %v1864_v42  ;;  %v1878_v34 = vsub.f32 %v1854_v20, %v1864_v42  ;;  %v1879_v38 = vsub.f32 %v1855_v23, %v1864_v42  ;;  %v2445_v27 = vld [vmem:[%s564_s23] ss:$0 sm:$0xff] }
 0xc88   : > { %v1876_v45 = vsub.f32 %v1874_v44, %v1875_v43 }
 0xc8a   : > { %v1877_v41 = vmax.f32 %v1876_v45, 0.0 }
 0xc8c   : > { %v1880_v46 = vadd.f32 1e-05, %v1877_v41 }
 0xc8e   : > { %2883 = vrsqrt.f32 %v1880_v46 }
 0xc98   : > { %v2884_v47 = vpop.eup %2883 }
 0xc99   : > { %v1882_v49 = vmul.f32 %v2884_v47, %v1878_v34  ;;  %v1883_v50 = vmul.f32 %v2884_v47, %v1879_v38 }
 0xc9b   : > { %v1891_v52 = vmul.f32 %v2425_v48, %v1882_v49  ;;  %v1892_v53 = vmul.f32 %v2425_v48, %v1883_v50 }
 0xc9d   : > { %v1900_v54 = vadd.f32 %v2426_v51, %v1891_v52  ;;  %v1901_v55 = vadd.f32 %v2426_v51, %v1892_v53 }
 0xc9f   : > { %v1902_v56 = vpack.c.bf16 %v1901_v55, %v1900_v54 }
 0xca1   : > { %2680 = vmatmul.mubr.bf16.vlgmr.msra.gmra.mrb[44].mxu1 %v1902_v56 }
 0xd74   : > { %v2008_v59 = vpop.f32.mrb[44].mxu1 }
 0xd75   : > { %v2009_v60 = vadd.f32 %v2427_v58, %v2008_v59  ;;  %v2681_v61 = vpop.f32.mrb[45].mxu1 }
 0xd76   : > { %v2011_v62 = vpop.f32.mrb[46].mxu1 }
 0xd77   : > { %v2012_v63 = vadd.f32 %v2427_v58, %v2011_v62  ;;  %v2682_v0 = vpop.f32.mrb[47].mxu1  ;;  %v2015_v1 = vmax.f32 %v2009_v60, 0.0 }
 0xd79   : > { %v2016_v2 = vmax.f32 %v2012_v63, 0.0 }
 0xd7b   : > { %v2017_v3 = vpack.c.bf16 %v2016_v2, %v2015_v1 }
 0xd7d   : > { %2700 = vmatmul.mubr.bf16.vlgmr.msra.gmra.mrb[32].mxu0 %v2017_v3 }
 0xe50   : > { %v2116_v4 = vpop.f32.mrb[32].mxu0 }
 0xe51   : > { %v2123_v5 = vadd.f32 %v2116_v4, %v1900_v54  ;;  %v2701_v6 = vpop.f32.mrb[33].mxu0 }
 0xe52   : > { %v2119_v7 = vpop.f32.mrb[34].mxu0 }
 0xe53   : > { %v2124_v8 = vadd.f32 %v2119_v7, %v1901_v55  ;;  %v2702_v10 = vpop.f32.mrb[35].mxu0  ;;  %v2133_v11 = vmul.f32 %v2123_v5, %v2123_v5 }
 0xe55   : > { %v2125_v13 = vadd.f32 %v2124_v8, %v2123_v5  ;;  %v2134_v14 = vmul.f32 %v2124_v8, %v2124_v8 }
 0xe57   : > { %v2126_v15 = vrot.slane %v2125_v13, 4  ;;  %v2135_v17 = vadd.f32 %v2134_v14, %v2133_v11 }
 0xe59   : > { %v2127_v18 = vadd.f32 %v2126_v15, %v2125_v13  ;;  %v2136_v19 = vrot.slane %v2135_v17, 4 }
 0xe5b   : > { %v2128_v20 = vrot.slane %v2127_v18, 2  ;;  %v2137_v21 = vadd.f32 %v2136_v19, %v2135_v17 }
 0xe5d   : > { %v2129_v22 = vadd.f32 %v2128_v20, %v2127_v18  ;;  %v2138_v23 = vrot.slane %v2137_v21, 2 }
 0xe5f   : > { %v2130_v24 = vrot.slane %v2129_v22, 1  ;;  %v2139_v25 = vadd.f32 %v2138_v23, %v2137_v21 }
 0xe61   : > { %v2131_v9 = vadd.f32 %v2130_v24, %v2129_v22  ;;  %v2140_v12 = vrot.slane %v2139_v25, 1 }
 0xe63   : > { %v2132_v16 = vmul.f32 0.0625, %v2131_v9  ;;  %v2141_v28 = vadd.f32 %v2140_v12, %v2139_v25 }
 0xe65   : > { %v2142_v29 = vmul.f32 0.0625, %v2141_v28  ;;  %v2143_v30 = vmul.f32 %v2132_v16, %v2132_v16  ;;  %v2146_v31 = vsub.f32 %v2123_v5, %v2132_v16  ;;  %v2147_v32 = vsub.f32 %v2124_v8, %v2132_v16 }
 0xe67   : > { %v2144_v33 = vsub.f32 %v2142_v29, %v2143_v30 }
 0xe69   : > { %v2145_v35 = vmax.f32 %v2144_v33, 0.0 }
 0xe6b   : > { %v2148_v36 = vadd.f32 1e-05, %v2145_v35 }
 0xe6d   : > { %2885 = vrsqrt.f32 %v2148_v36 }
 0xe77   : > { %v2886_v37 = vpop.eup %2885 }
 0xe78   : > { %v2150_v40 = vmul.f32 %v2886_v37, %v2146_v31  ;;  %v2151_v42 = vmul.f32 %v2886_v37, %v2147_v32 }
 0xe7a   : > { %v2159_v44 = vmul.f32 %v2444_v26, %v2150_v40  ;;  %v2160_v43 = vmul.f32 %v2444_v26, %v2151_v42 }
 0xe7c   : > { %v2168_v34 = vadd.f32 %v2445_v27, %v2159_v44  ;;  %v2169_v38 = vadd.f32 %v2445_v27, %v2160_v43 }
 0xe7e   : > { %2170 = vst [vmem:[#allocation12] sm:$0xff] %v2168_v34  ;;  %2171 = vst [vmem:[#allocation12 + $0x8] sm:$0xff] %v2169_v38 }
 0xe7f   : > { %3048 = shalt.err (!%p3045_p13)
}
 0xe80   : > { %s3847_s23 = sld [smem:[#allocation23_spill]] }
 0xe86   : > { %s3049_s22 = scalar_lea.hbm %s3847_s23, 256 }
 0xe87   : > { %p3050_p12 = scmp.ne.s32.totalorder %s3847_s23, %s3049_s22  ;;  %p3055_p3 = scmp.lt.u32.totalorder %s3049_s22, %s3847_s23 }
 0xe89   : > { %p3051_p10 = pnand %p3050_p12, %p2742_p11 }
 0xe8b   : > { %p3052_p9 = pneg %p3051_p10 }
 0xe8d   : > { %p3057_p6 = pnand %p3055_p3, %p3052_p9 }
 0xe8f   : > { %3060 = shalt.err (!%p3057_p6)
}
 0xe90   : > { %s3131_s17 = smov 128  }
 0xe91   : > { %2719 = dma.vmem_to_hbm [thread:$0]  (%p2742_p11), %s2179_s10, 256, %s3847_s23, [#allocation5], %s3131_s17, %s3131_s17, %s3127_s20  }
 0xe92   : > { %3090 = dma.done.wait (%p2742_p11), [#allocation5], 256  }
 0xe93   : > { %3092 = vsyncadd (%p2742_p11), [#allocation5], 4294967040 }
 0xe94 PF: > { %s3848_s16 = sld [smem:[#allocation18_spill]]  ;;  %s3849_s12 = sld [smem:[#allocation17_spill]] }
 0xe95   : > { %s3850_s15 = sld [smem:[#allocation19_spill]]  ;;  %s3851_s13 = smov %s3099_s14 }
 0xe9a   : > { %p25_p4 = scmp.ge.s32.totalorder %s3848_s16, 4   ;;  %s3852_s14 = smov %s3849_s12 }
 0xe9c   :  { %27 = sbr.rel (!%p25_p4) target bundleno = 12 (0xc), region = 156 }
 0xea3   :  { %2194 = vsyncpa [#allocation4], 1 }
 0xea4   :  { %2196 = vsyncpa [#allocation4 + $0x1], 1 }
 0xea5   :  { %2197 = vsyncpa [#allocation7], 1 }
 0xea6   :  { %2199 = vsyncpa [#allocation7 + $0x1], 1 }
 0xea7   :  { %2200 = vsyncpa [#allocation10], 1 }
 0xea8   :  { %2202 = vsyncpa [#allocation10 + $0x1], 1 }
 0xea9   :  { %2203 = vsyncpa [#allocation5], 1 }
 0xeaa   :  { %2205 = vsyncpa [#allocation5 + $0x1], 1 }

</bundles_post_ra>
